<compile_context>
chip_gen: v7x
topology: tpu7x:2x2x1
jax: 0.10.0
libtpu: 0.0.40
codegen_flags: <defaults>
</compile_context>

<pallas_src>
import math

import jax
import jax.numpy as jnp
from jax.experimental import pallas as pl
from jax.experimental.pallas import tpu as pltpu

# ----------------------------- configuration --------------------------------
B = 2                    # batch
MAX_EP_LEN = 8           # args.max_episode_length
HIDDEN = 32              # args.hidden_size == args.k_hidden_size == args.embedding_size
N_HEADS = 2              # args.k_n_heads
HEAD_DIM = HIDDEN // N_HEADS
FFN = 64                 # args.k_ffn_size
N_LAYERS = 2             # args.k_n_layers
NEG_INF = -1e30
LN_EPS = 1e-5


# ----------------------------- Pallas kernel --------------------------------
def _layer_norm(x, g, b):
    mu = jnp.mean(x, axis=-1, keepdims=True)
    var = jnp.mean(jnp.square(x - mu), axis=-1, keepdims=True)
    return (x - mu) * jax.lax.rsqrt(var + LN_EPS) * g + b


def transformer_kernel(x_ref, km_ref,
                       wqkv_ref, wo_ref, w1_ref, w2_ref,
                       vecs_ref, head_ref,
                       out_ref):
    _, bsz, s, h = x_ref.shape
    n_layers = w1_ref.shape[0]
    ffn = w1_ref.shape[2]
    head_dim = h // N_HEADS
    bs = bsz * s
    scale = 1.0 / math.sqrt(head_dim)

    # Combined additive attention mask: (causal AND key-valid) built in-kernel.
    rows = jax.lax.broadcasted_iota(jnp.int32, (s, s), 0)
    cols = jax.lax.broadcasted_iota(jnp.int32, (s, s), 1)
    causal_ok = rows >= cols                                   # [S, S]
    key_ok = km_ref[0] > 0.5                                   # [B, S]
    allow = jnp.logical_and(causal_ok[None, :, :], key_ok[:, None, :])
    mask = jnp.where(allow, 0.0, NEG_INF)                      # [B, S, S]

    # Process all B*S rows as one slab for row-wise ops / projections.
    x2 = x_ref[0].astype(jnp.float32).reshape(bs, h)           # [B*S, H]

    for l in range(n_layers):
        # --- fused QKV projection (single MXU op per layer) ---
        qkv = jnp.dot(x2, wqkv_ref[l], preferred_element_type=jnp.float32)
        qkv = qkv + vecs_ref[l, 0:1, 0:3 * h]                  # [B*S, 3H]
        q = qkv[:, 0:h].reshape(bsz, s, h)
        k = qkv[:, h:2 * h].reshape(bsz, s, h)
        v = qkv[:, 2 * h:3 * h].reshape(bsz, s, h)

        # --- multi-head attention; head concat folded into Wo row-blocks ---
        attn2 = jnp.zeros((bs, h), jnp.float32)
        for hd in range(N_HEADS):
            sl = slice(hd * head_dim, (hd + 1) * head_dim)
            qh, kh, vh = q[:, :, sl], k[:, :, sl], v[:, :, sl]
            sc = jnp.einsum('bqd,bkd->bqk', qh, kh,
                            preferred_element_type=jnp.float32) * scale + mask
            sc = sc - jnp.max(sc, axis=-1, keepdims=True)
            p = jnp.exp(sc)
            p = p * pl.reciprocal(jnp.sum(p, axis=-1, keepdims=True), approx=True)
            ctx = jnp.einsum('bqk,bkd->bqd', p, vh,
                             preferred_element_type=jnp.float32)       # [B, S, Hd]
            attn2 = attn2 + jnp.dot(ctx.reshape(bs, head_dim), wo_ref[l, sl, :],
                                    preferred_element_type=jnp.float32)
        attn2 = attn2 + vecs_ref[l, 1:2, 0:h]                  # attn output bias
        x2 = _layer_norm(x2 + attn2, vecs_ref[l, 4:5, 0:h], vecs_ref[l, 5:6, 0:h])

        # --- feed-forward ---
        ff = jnp.dot(x2, w1_ref[l], preferred_element_type=jnp.float32)
        ff = ff + vecs_ref[l, 2:3, 0:ffn]
        # TODO(synk): PyTorch uses exact erf-GELU; tanh approximation used here.
        ff = jax.nn.gelu(ff, approximate=True)
        ff = jnp.dot(ff, w2_ref[l], preferred_element_type=jnp.float32)
        ff = ff + vecs_ref[l, 3:4, 0:h]
        x2 = _layer_norm(x2 + ff, vecs_ref[l, 6:7, 0:h], vecs_ref[l, 7:8, 0:h])

    # final encoder norm (TransformerEncoder(norm=LayerNorm(hidden))) + project_s
    x2 = _layer_norm(x2, head_ref[0:1, :], head_ref[1:2, :])
    x3 = x2.reshape(bsz, s, h)
    logit = jnp.sum(x3 * head_ref[2:3, :], axis=-1) + head_ref[3:4, 0:1]   # [B, S]
    out_ref[0] = logit.astype(out_ref.dtype)


def run_transformer(xs, keymask, tf_weights):
    """xs: [2, B, S_PAD, H] f32; keymask: [2, B, S_PAD] f32 (1.0 = attendable key)."""
    nstack, bsz, s, h = xs.shape
    wqkv, wo, w1, w2, vecs, head = tf_weights
    in_specs = [
        pl.BlockSpec((1, bsz, s, h), lambda i: (i, 0, 0, 0)),
        pl.BlockSpec((1, bsz, s), lambda i: (i, 0, 0)),
        pl.BlockSpec(wqkv.shape, lambda i: (0, 0, 0)),
        pl.BlockSpec(wo.shape, lambda i: (0, 0, 0)),
        pl.BlockSpec(w1.shape, lambda i: (0, 0, 0)),
        pl.BlockSpec(w2.shape, lambda i: (0, 0, 0)),
        pl.BlockSpec(vecs.shape, lambda i: (0, 0, 0)),
        pl.BlockSpec(head.shape, lambda i: (0, 0)),
    ]
    out_spec = pl.BlockSpec((1, bsz, s), lambda i: (i, 0, 0))
    logits = pl.pallas_call(
        transformer_kernel,
        out_shape=jax.ShapeDtypeStruct((nstack, bsz, s), jnp.float32),
        grid_spec=pltpu.PrefetchScalarGridSpec(
            num_scalar_prefetch=0,
            grid=(nstack,),
            in_specs=in_specs,
            out_specs=out_spec),
        compiler_params=pltpu.CompilerParams(
            dimension_semantics=("parallel",)),
    )(xs, keymask, wqkv, wo, w1, w2, vecs, head)
    return logits


# ----------------------------- parameters -----------------------------------
def init_params(key):
    keys = jax.random.split(key, 16)
    ki = iter(keys)

    def nrm(shape, scale=0.02):
        return scale * jax.random.normal(next(ki), shape, dtype=jnp.float32)

    h3 = 3 * HIDDEN
    vec_w = max(h3, FFN)
    # Packed per-layer vectors: [L, 8, vec_w]
    #   row 0: qkv bias (3H) | 1: attn-out bias (H) | 2: ffn bias1 (FFN) | 3: ffn bias2 (H)
    #   row 4/5: norm1 gamma/beta | row 6/7: norm2 gamma/beta
    vecs = jnp.zeros((N_LAYERS, 8, vec_w), jnp.float32)
    vecs = vecs.at[:, 0, 0:h3].set(nrm((N_LAYERS, h3)))
    vecs = vecs.at[:, 1, 0:HIDDEN].set(nrm((N_LAYERS, HIDDEN)))
    vecs = vecs.at[:, 2, 0:FFN].set(nrm((N_LAYERS, FFN)))
    vecs = vecs.at[:, 3, 0:HIDDEN].set(nrm((N_LAYERS, HIDDEN)))
    vecs = vecs.at[:, 4, 0:HIDDEN].set(1.0)      # norm1 gamma (beta row 5 stays 0)
    vecs = vecs.at[:, 6, 0:HIDDEN].set(1.0)      # norm2 gamma (beta row 7 stays 0)

    # Packed head: [4, H] = final-norm gamma / beta, project_s weight, project_s bias.
    head = jnp.zeros((4, HIDDEN), jnp.float32)
    head = head.at[0, :].set(1.0)
    head = head.at[2, :].set(nrm((HIDDEN,)))
    head = head.at[3, :].set(nrm(()))            # bias replicated across lanes

    tf_weights = (
        nrm((N_LAYERS, HIDDEN, 3 * HIDDEN)),     # fused Wqkv (x @ W convention)
        nrm((N_LAYERS, HIDDEN, HIDDEN)),         # Wo (attn out proj)
        nrm((N_LAYERS, HIDDEN, FFN)),            # ffn linear1
        nrm((N_LAYERS, FFN, HIDDEN)),            # ffn linear2
        vecs,
        head,
    )
    return {
        "tf_weights": tf_weights,
        "turn_emb": nrm((MAX_EP_LEN + 1, HIDDEN), scale=1.0),
        "start_emb": nrm((1, HIDDEN), scale=1.0),
    }


# ----------------------------- forward (module semantics) -------------------
def forward(params, knowledge_pooling_use, episode_mask, rng):
    bsz, L = episode_mask.shape
    H = knowledge_pooling_use.shape[-1]
    s1 = L + 1                           # full-episode sequence length
    s2 = L                               # deleted-episode sequence length
    s_pad = ((s1 + 7) // 8) * 8          # common padded length (sublane multiple)
    tfw = params["tf_weights"]

    # ----- branch 1: full episode (reference passes no key padding mask) -----
    start = jnp.broadcast_to(params["start_emb"][0], (bsz, 1, H))
    input_embedding = jnp.concatenate([start, knowledge_pooling_use], axis=1)   # [B, L+1, H]
    x1 = input_embedding + params["turn_emb"][None, :s1, :]
    x1 = jnp.pad(x1, ((0, 0), (0, s_pad - s1), (0, 0)))
    km1 = jnp.pad(jnp.ones((bsz, s1), jnp.float32), ((0, 0), (0, s_pad - s1)))

    # ----- branch 2: self-supervised random turn deletion -----
    key_mask = jnp.concatenate(
        [jnp.ones((bsz, 1), dtype=bool), episode_mask], axis=1)                 # [B, L+1]
    active_num = jnp.sum(key_mask.astype(jnp.int32), axis=1)
    rbits = jax.random.randint(rng, (bsz,), 0, 1 << 30)
    # torch.randint(1, active_num - 1) -> uniform over {1, ..., active_num - 2}
    deleted_index = 1 + rbits % (active_num - 2)

    idx = jnp.arange(L)[None, :]
    gather_idx = jnp.where(idx < deleted_index[:, None], idx, idx + 1)          # [B, L]
    deleted_input = jnp.take_along_axis(input_embedding,
                                        gather_idx[:, :, None], axis=1)         # [B, L, H]
    deleted_key_mask = jnp.take_along_axis(key_mask, gather_idx, axis=1)        # [B, L]

    x2 = deleted_input + params["turn_emb"][None, :s2, :]
    x2 = jnp.pad(x2, ((0, 0), (0, s_pad - s2), (0, 0)))
    km2 = jnp.pad(deleted_key_mask.astype(jnp.float32), ((0, 0), (0, s_pad - s2)))

    # ----- one fused Pallas call for both branches -----
    xs = jnp.stack([x1, x2], axis=0)                 # [2, B, S_PAD, H]
    kms = jnp.stack([km1, km2], axis=0)              # [2, B, S_PAD]
    logits = run_transformer(xs, kms, tfw)           # [2, B, S_PAD]

    state_pro = logits[0, :, 1:s1].reshape(-1, 1)
    user_prob = jax.nn.sigmoid(state_pro)
    state_pro_ss = logits[1, :, :s2][..., None]      # [B, L, 1]
    user_prob_ss = jax.nn.sigmoid(state_pro_ss)

    return (user_prob, state_pro, user_prob_ss, state_pro_ss,
            deleted_index, deleted_key_mask)


# ----------------------------- main ------------------------------------------
if __name__ == "__main__":
    key = jax.random.PRNGKey(0)
    pkey, xkey, rkey = jax.random.split(key, 3)

    params = init_params(pkey)
    knowledge_pooling_use = jax.random.normal(
        xkey, (B, MAX_EP_LEN, HIDDEN), dtype=jnp.float32)
    episode_mask = jnp.array(
        [[True] * MAX_EP_LEN,
         [True] * 5 + [False] * (MAX_EP_LEN - 5)], dtype=bool)

    fwd = jax.jit(forward)
    outs = fwd(params, knowledge_pooling_use, episode_mask, rkey)
    outs = jax.block_until_ready(outs)

    user_prob, state_pro, user_prob_ss, state_pro_ss, del_idx, del_mask = outs
    assert user_prob.shape == (B * MAX_EP_LEN, 1)
    assert state_pro.shape == (B * MAX_EP_LEN, 1)
    assert user_prob_ss.shape == (B, MAX_EP_LEN, 1)
    assert state_pro_ss.shape == (B, MAX_EP_LEN, 1)
    assert del_idx.shape == (B,)
    assert del_mask.shape == (B, MAX_EP_LEN)
    assert bool(jnp.all(jnp.isfinite(user_prob)))
    assert bool(jnp.all(jnp.isfinite(user_prob_ss)))
    print("KERNEL_OK")
</pallas_src>

<mosaic_0001>
module attributes {stable_mosaic.version = 11 : i64} {
  func.func @transformer_kernel(%arg0: i32, %arg1: memref<1x2x16x32xf32, #tpu.memory_space<vmem>>, %arg2: memref<1x2x16xf32, #tpu.memory_space<vmem>>, %arg3: memref<2x32x96xf32, #tpu.memory_space<vmem>>, %arg4: memref<2x32x32xf32, #tpu.memory_space<vmem>>, %arg5: memref<2x32x64xf32, #tpu.memory_space<vmem>>, %arg6: memref<2x64x32xf32, #tpu.memory_space<vmem>>, %arg7: memref<2x8x96xf32, #tpu.memory_space<vmem>>, %arg8: memref<4x32xf32, #tpu.memory_space<vmem>>, %arg9: memref<1x2x16xf32, #tpu.memory_space<vmem>>) attributes {dimension_semantics = [#tpu.dimension_semantics<parallel>], iteration_bounds = array<i64: 2>, scalar_prefetch = 0 : i64, scratch_operands = 0 : i64, tpu.core_type = #tpu.core_type<tc>, window_params = [{transform_indices = @transform_0, window_bounds = array<i64: 1, 2, 16, 32>}, {transform_indices = @transform_1, window_bounds = array<i64: 1, 2, 16>}, {pipeline_mode = #tpu.pipeline_mode<synchronous>, transform_indices = @transform_2, window_bounds = array<i64: 2, 32, 96>}, {pipeline_mode = #tpu.pipeline_mode<synchronous>, transform_indices = @transform_3, window_bounds = array<i64: 2, 32, 32>}, {pipeline_mode = #tpu.pipeline_mode<synchronous>, transform_indices = @transform_4, window_bounds = array<i64: 2, 32, 64>}, {pipeline_mode = #tpu.pipeline_mode<synchronous>, transform_indices = @transform_5, window_bounds = array<i64: 2, 64, 32>}, {pipeline_mode = #tpu.pipeline_mode<synchronous>, transform_indices = @transform_6, window_bounds = array<i64: 2, 8, 96>}, {pipeline_mode = #tpu.pipeline_mode<synchronous>, transform_indices = @transform_7, window_bounds = array<i64: 4, 32>}, {transform_indices = @transform_8, window_bounds = array<i64: 1, 2, 16>}]} {
    %0 = tpu.iota {dimensions = array<i32: 0>} : vector<16x16xi32>
    %1 = tpu.iota {dimensions = array<i32: 1>} : vector<16x16xi32>
    %2 = arith.cmpi sge, %0, %1 : vector<16x16xi32>
    %c0 = arith.constant 0 : index
    %c0_0 = arith.constant 0 : index
    %c0_1 = arith.constant 0 : index
    %3 = vector.load %arg2[%c0, %c0_0, %c0_1] : memref<1x2x16xf32, #tpu.memory_space<vmem>>, vector<1x2x16xf32>
    %4 = vector.shape_cast %3 : vector<1x2x16xf32> to vector<2x16xf32>
    %cst = arith.constant 5.000000e-01 : f32
    %5 = vector.broadcast %cst : f32 to vector<2x16xf32>
    %6 = arith.cmpf ogt, %4, %5 : vector<2x16xf32>
    %7 = vector.shape_cast %2 : vector<16x16xi1> to vector<1x16x16xi1>
    %8 = vector.shape_cast %6 : vector<2x16xi1> to vector<2x1x16xi1>
    %9 = vector.broadcast %7 : vector<1x16x16xi1> to vector<2x16x16xi1>
    %10 = vector.broadcast %8 : vector<2x1x16xi1> to vector<2x16x16xi1>
    %11 = arith.andi %9, %10 : vector<2x16x16xi1>
    %cst_2 = arith.constant 0.000000e+00 : f32
    %cst_3 = arith.constant -1.000000e+30 : f32
    %12 = vector.broadcast %cst_2 : f32 to vector<2x16x16xf32>
    %13 = vector.broadcast %cst_3 : f32 to vector<2x16x16xf32>
    %14 = arith.select %11, %12, %13 : vector<2x16x16xi1>, vector<2x16x16xf32>
    %c0_4 = arith.constant 0 : index
    %c0_5 = arith.constant 0 : index
    %c0_6 = arith.constant 0 : index
    %c0_7 = arith.constant 0 : index
    %15 = vector.load %arg1[%c0_4, %c0_5, %c0_6, %c0_7] : memref<1x2x16x32xf32, #tpu.memory_space<vmem>>, vector<1x2x16x32xf32>
    %16 = vector.shape_cast %15 : vector<1x2x16x32xf32> to vector<2x16x32xf32>
    %17 = vector.shape_cast %16 : vector<2x16x32xf32> to vector<32x32xf32>
    %c0_8 = arith.constant 0 : index
    %c0_9 = arith.constant 0 : index
    %c0_10 = arith.constant 0 : index
    %18 = vector.load %arg3[%c0_8, %c0_9, %c0_10] : memref<2x32x96xf32, #tpu.memory_space<vmem>>, vector<1x32x96xf32>
    %19 = vector.shape_cast %18 : vector<1x32x96xf32> to vector<32x96xf32>
    %cst_11 = arith.constant dense<0.000000e+00> : vector<32x96xf32>
    %20 = tpu.matmul %17, %19, %cst_11 {dimension_numbers = #tpu.dot_dimension_numbers<[1], [0], [0], [1], [0, 0, 1, 1], [], []>} : vector<32x32xf32>, vector<32x96xf32>, vector<32x96xf32> -> vector<32x96xf32>
    %c0_12 = arith.constant 0 : index
    %c0_13 = arith.constant 0 : index
    %c0_14 = arith.constant 0 : index
    %21 = vector.load %arg7[%c0_12, %c0_13, %c0_14] : memref<2x8x96xf32, #tpu.memory_space<vmem>>, vector<1x1x96xf32>
    %22 = vector.shape_cast %21 : vector<1x1x96xf32> to vector<1x96xf32>
    %23 = vector.broadcast %22 : vector<1x96xf32> to vector<32x96xf32>
    %24 = arith.addf %20, %23 : vector<32x96xf32>
    %25 = vector.extract_strided_slice %24 {offsets = [0, 0], sizes = [32, 32], strides = [1, 1]} : vector<32x96xf32> to vector<32x32xf32>
    %26 = vector.shape_cast %25 : vector<32x32xf32> to vector<2x16x32xf32>
    %27 = vector.extract_strided_slice %24 {offsets = [0, 32], sizes = [32, 32], strides = [1, 1]} : vector<32x96xf32> to vector<32x32xf32>
    %28 = vector.shape_cast %27 : vector<32x32xf32> to vector<2x16x32xf32>
    %29 = vector.extract_strided_slice %24 {offsets = [0, 64], sizes = [32, 32], strides = [1, 1]} : vector<32x96xf32> to vector<32x32xf32>
    %30 = vector.shape_cast %29 : vector<32x32xf32> to vector<2x16x32xf32>
    %cst_15 = arith.constant 0.000000e+00 : f32
    %31 = vector.broadcast %cst_15 : f32 to vector<32x32xf32>
    %32 = vector.extract_strided_slice %26 {offsets = [0, 0, 0], sizes = [2, 16, 16], strides = [1, 1, 1]} : vector<2x16x32xf32> to vector<2x16x16xf32>
    %33 = vector.extract_strided_slice %28 {offsets = [0, 0, 0], sizes = [2, 16, 16], strides = [1, 1, 1]} : vector<2x16x32xf32> to vector<2x16x16xf32>
    %34 = vector.extract_strided_slice %30 {offsets = [0, 0, 0], sizes = [2, 16, 16], strides = [1, 1, 1]} : vector<2x16x32xf32> to vector<2x16x16xf32>
    "tpu.trace_start"() <{level = 10 : i32, message = "bqd,bkd->bqk"}> : () -> ()
    %cst_16 = arith.constant dense<0.000000e+00> : vector<2x16x16xf32>
    %35 = tpu.matmul %32, %33, %cst_16 {dimension_numbers = #tpu.dot_dimension_numbers<[2], [2], [1], [1], [0, 0, 0, 1, 1, 1], [0], [0]>} : vector<2x16x16xf32>, vector<2x16x16xf32>, vector<2x16x16xf32> -> vector<2x16x16xf32>
    "tpu.trace_stop"() : () -> ()
    %cst_17 = arith.constant 2.500000e-01 : f32
    %36 = vector.broadcast %cst_17 : f32 to vector<2x16x16xf32>
    %37 = arith.mulf %35, %36 : vector<2x16x16xf32>
    %38 = arith.addf %37, %14 : vector<2x16x16xf32>
    %cst_18 = arith.constant dense<0xFF800000> : vector<2x16xf32>
    %39 = vector.multi_reduction <maximumf>, %38, %cst_18 [2] : vector<2x16x16xf32> to vector<2x16xf32>
    %40 = vector.shape_cast %39 : vector<2x16xf32> to vector<2x16x1xf32>
    %41 = vector.broadcast %40 : vector<2x16x1xf32> to vector<2x16x16xf32>
    %42 = arith.subf %38, %41 : vector<2x16x16xf32>
    %43 = math.exp %42 : vector<2x16x16xf32>
    %cst_19 = arith.constant dense<0.000000e+00> : vector<2x16xf32>
    %44 = vector.multi_reduction <add>, %43, %cst_19 [2] : vector<2x16x16xf32> to vector<2x16xf32>
    %45 = vector.shape_cast %44 : vector<2x16xf32> to vector<2x16x1xf32>
    %46 = tpu.reciprocal %45 {approx = true} : vector<2x16x1xf32> -> vector<2x16x1xf32>
    %47 = vector.broadcast %46 : vector<2x16x1xf32> to vector<2x16x16xf32>
    %48 = arith.mulf %43, %47 : vector<2x16x16xf32>
    "tpu.trace_start"() <{level = 10 : i32, message = "bqk,bkd->bqd"}> : () -> ()
    %cst_20 = arith.constant dense<0.000000e+00> : vector<2x16x16xf32>
    %49 = tpu.matmul %48, %34, %cst_20 {dimension_numbers = #tpu.dot_dimension_numbers<[2], [1], [1], [2], [0, 0, 0, 1, 1, 2], [0], [0]>} : vector<2x16x16xf32>, vector<2x16x16xf32>, vector<2x16x16xf32> -> vector<2x16x16xf32>
    "tpu.trace_stop"() : () -> ()
    %50 = vector.shape_cast %49 : vector<2x16x16xf32> to vector<32x16xf32>
    %c0_21 = arith.constant 0 : index
    %c0_22 = arith.constant 0 : index
    %c0_23 = arith.constant 0 : index
    %51 = vector.load %arg4[%c0_21, %c0_22, %c0_23] : memref<2x32x32xf32, #tpu.memory_space<vmem>>, vector<1x16x32xf32>
    %52 = vector.shape_cast %51 : vector<1x16x32xf32> to vector<16x32xf32>
    %cst_24 = arith.constant dense<0.000000e+00> : vector<32x32xf32>
    %53 = tpu.matmul %50, %52, %cst_24 {dimension_numbers = #tpu.dot_dimension_numbers<[1], [0], [0], [1], [0, 0, 1, 1], [], []>} : vector<32x16xf32>, vector<16x32xf32>, vector<32x32xf32> -> vector<32x32xf32>
    %54 = arith.addf %31, %53 : vector<32x32xf32>
    %55 = vector.extract_strided_slice %26 {offsets = [0, 0, 16], sizes = [2, 16, 16], strides = [1, 1, 1]} : vector<2x16x32xf32> to vector<2x16x16xf32>
    %56 = vector.extract_strided_slice %28 {offsets = [0, 0, 16], sizes = [2, 16, 16], strides = [1, 1, 1]} : vector<2x16x32xf32> to vector<2x16x16xf32>
    %57 = vector.extract_strided_slice %30 {offsets = [0, 0, 16], sizes = [2, 16, 16], strides = [1, 1, 1]} : vector<2x16x32xf32> to vector<2x16x16xf32>
    "tpu.trace_start"() <{level = 10 : i32, message = "bqd,bkd->bqk"}> : () -> ()
    %cst_25 = arith.constant dense<0.000000e+00> : vector<2x16x16xf32>
    %58 = tpu.matmul %55, %56, %cst_25 {dimension_numbers = #tpu.dot_dimension_numbers<[2], [2], [1], [1], [0, 0, 0, 1, 1, 1], [0], [0]>} : vector<2x16x16xf32>, vector<2x16x16xf32>, vector<2x16x16xf32> -> vector<2x16x16xf32>
    "tpu.trace_stop"() : () -> ()
    %cst_26 = arith.constant 2.500000e-01 : f32
    %59 = vector.broadcast %cst_26 : f32 to vector<2x16x16xf32>
    %60 = arith.mulf %58, %59 : vector<2x16x16xf32>
    %61 = arith.addf %60, %14 : vector<2x16x16xf32>
    %cst_27 = arith.constant dense<0xFF800000> : vector<2x16xf32>
    %62 = vector.multi_reduction <maximumf>, %61, %cst_27 [2] : vector<2x16x16xf32> to vector<2x16xf32>
    %63 = vector.shape_cast %62 : vector<2x16xf32> to vector<2x16x1xf32>
    %64 = vector.broadcast %63 : vector<2x16x1xf32> to vector<2x16x16xf32>
    %65 = arith.subf %61, %64 : vector<2x16x16xf32>
    %66 = math.exp %65 : vector<2x16x16xf32>
    %cst_28 = arith.constant dense<0.000000e+00> : vector<2x16xf32>
    %67 = vector.multi_reduction <add>, %66, %cst_28 [2] : vector<2x16x16xf32> to vector<2x16xf32>
    %68 = vector.shape_cast %67 : vector<2x16xf32> to vector<2x16x1xf32>
    %69 = tpu.reciprocal %68 {approx = true} : vector<2x16x1xf32> -> vector<2x16x1xf32>
    %70 = vector.broadcast %69 : vector<2x16x1xf32> to vector<2x16x16xf32>
    %71 = arith.mulf %66, %70 : vector<2x16x16xf32>
    "tpu.trace_start"() <{level = 10 : i32, message = "bqk,bkd->bqd"}> : () -> ()
    %cst_29 = arith.constant dense<0.000000e+00> : vector<2x16x16xf32>
    %72 = tpu.matmul %71, %57, %cst_29 {dimension_numbers = #tpu.dot_dimension_numbers<[2], [1], [1], [2], [0, 0, 0, 1, 1, 2], [0], [0]>} : vector<2x16x16xf32>, vector<2x16x16xf32>, vector<2x16x16xf32> -> vector<2x16x16xf32>
    "tpu.trace_stop"() : () -> ()
    %73 = vector.shape_cast %72 : vector<2x16x16xf32> to vector<32x16xf32>
    %c0_30 = arith.constant 0 : index
    %c16 = arith.constant 16 : index
    %c0_31 = arith.constant 0 : index
    %74 = vector.load %arg4[%c0_30, %c16, %c0_31] : memref<2x32x32xf32, #tpu.memory_space<vmem>>, vector<1x16x32xf32>
    %75 = vector.shape_cast %74 : vector<1x16x32xf32> to vector<16x32xf32>
    %cst_32 = arith.constant dense<0.000000e+00> : vector<32x32xf32>
    %76 = tpu.matmul %73, %75, %cst_32 {dimension_numbers = #tpu.dot_dimension_numbers<[1], [0], [0], [1], [0, 0, 1, 1], [], []>} : vector<32x16xf32>, vector<16x32xf32>, vector<32x32xf32> -> vector<32x32xf32>
    %77 = arith.addf %54, %76 : vector<32x32xf32>
    %c0_33 = arith.constant 0 : index
    %c1 = arith.constant 1 : index
    %c0_34 = arith.constant 0 : index
    %78 = vector.load %arg7[%c0_33, %c1, %c0_34] : memref<2x8x96xf32, #tpu.memory_space<vmem>>, vector<1x1x32xf32>
    %79 = vector.shape_cast %78 : vector<1x1x32xf32> to vector<1x32xf32>
    %80 = vector.broadcast %79 : vector<1x32xf32> to vector<32x32xf32>
    %81 = arith.addf %77, %80 : vector<32x32xf32>
    %82 = arith.addf %17, %81 : vector<32x32xf32>
    %c0_35 = arith.constant 0 : index
    %c4 = arith.constant 4 : index
    %c0_36 = arith.constant 0 : index
    %83 = vector.load %arg7[%c0_35, %c4, %c0_36] : memref<2x8x96xf32, #tpu.memory_space<vmem>>, vector<1x1x32xf32>
    %84 = vector.shape_cast %83 : vector<1x1x32xf32> to vector<1x32xf32>
    %c0_37 = arith.constant 0 : index
    %c5 = arith.constant 5 : index
    %c0_38 = arith.constant 0 : index
    %85 = vector.load %arg7[%c0_37, %c5, %c0_38] : memref<2x8x96xf32, #tpu.memory_space<vmem>>, vector<1x1x32xf32>
    %86 = vector.shape_cast %85 : vector<1x1x32xf32> to vector<1x32xf32>
    %cst_39 = arith.constant dense<0.000000e+00> : vector<32xf32>
    %87 = vector.multi_reduction <add>, %82, %cst_39 [1] : vector<32x32xf32> to vector<32xf32>
    %88 = vector.shape_cast %87 : vector<32xf32> to vector<32x1xf32>
    %cst_40 = arith.constant 3.200000e+01 : f32
    %89 = vector.broadcast %cst_40 : f32 to vector<32x1xf32>
    %90 = arith.divf %88, %89 : vector<32x1xf32>
    %91 = vector.broadcast %90 : vector<32x1xf32> to vector<32x32xf32>
    %92 = arith.subf %82, %91 : vector<32x32xf32>
    %93 = arith.mulf %92, %92 : vector<32x32xf32>
    %cst_41 = arith.constant dense<0.000000e+00> : vector<32xf32>
    %94 = vector.multi_reduction <add>, %93, %cst_41 [1] : vector<32x32xf32> to vector<32xf32>
    %95 = vector.shape_cast %94 : vector<32xf32> to vector<32x1xf32>
    %cst_42 = arith.constant 3.200000e+01 : f32
    %96 = vector.broadcast %cst_42 : f32 to vector<32x1xf32>
    %97 = arith.divf %95, %96 : vector<32x1xf32>
    %98 = vector.broadcast %90 : vector<32x1xf32> to vector<32x32xf32>
    %99 = arith.subf %82, %98 : vector<32x32xf32>
    %cst_43 = arith.constant 9.99999974E-6 : f32
    %100 = vector.broadcast %cst_43 : f32 to vector<32x1xf32>
    %101 = arith.addf %97, %100 : vector<32x1xf32>
    %102 = math.rsqrt %101 : vector<32x1xf32>
    %103 = vector.broadcast %102 : vector<32x1xf32> to vector<32x32xf32>
    %104 = arith.mulf %99, %103 : vector<32x32xf32>
    %105 = vector.broadcast %84 : vector<1x32xf32> to vector<32x32xf32>
    %106 = arith.mulf %104, %105 : vector<32x32xf32>
    %107 = vector.broadcast %86 : vector<1x32xf32> to vector<32x32xf32>
    %108 = arith.addf %106, %107 : vector<32x32xf32>
    %c0_44 = arith.constant 0 : index
    %c0_45 = arith.constant 0 : index
    %c0_46 = arith.constant 0 : index
    %109 = vector.load %arg5[%c0_44, %c0_45, %c0_46] : memref<2x32x64xf32, #tpu.memory_space<vmem>>, vector<1x32x64xf32>
    %110 = vector.shape_cast %109 : vector<1x32x64xf32> to vector<32x64xf32>
    %cst_47 = arith.constant dense<0.000000e+00> : vector<32x64xf32>
    %111 = tpu.matmul %108, %110, %cst_47 {dimension_numbers = #tpu.dot_dimension_numbers<[1], [0], [0], [1], [0, 0, 1, 1], [], []>} : vector<32x32xf32>, vector<32x64xf32>, vector<32x64xf32> -> vector<32x64xf32>
    %c0_48 = arith.constant 0 : index
    %c2 = arith.constant 2 : index
    %c0_49 = arith.constant 0 : index
    %112 = vector.load %arg7[%c0_48, %c2, %c0_49] : memref<2x8x96xf32, #tpu.memory_space<vmem>>, vector<1x1x64xf32>
    %113 = vector.shape_cast %112 : vector<1x1x64xf32> to vector<1x64xf32>
    %114 = vector.broadcast %113 : vector<1x64xf32> to vector<32x64xf32>
    %115 = arith.addf %111, %114 : vector<32x64xf32>
    %116 = arith.mulf %115, %115 : vector<32x64xf32>
    %117 = arith.mulf %115, %116 : vector<32x64xf32>
    %cst_50 = arith.constant 4.471500e-02 : f32
    %118 = vector.broadcast %cst_50 : f32 to vector<32x64xf32>
    %119 = arith.mulf %118, %117 : vector<32x64xf32>
    %120 = arith.addf %115, %119 : vector<32x64xf32>
    %cst_51 = arith.constant 0.797884583 : f32
    %121 = vector.broadcast %cst_51 : f32 to vector<32x64xf32>
    %122 = arith.mulf %121, %120 : vector<32x64xf32>
    %123 = math.tanh %122 : vector<32x64xf32>
    %cst_52 = arith.constant 1.000000e+00 : f32
    %124 = vector.broadcast %cst_52 : f32 to vector<32x64xf32>
    %125 = arith.addf %124, %123 : vector<32x64xf32>
    %cst_53 = arith.constant 5.000000e-01 : f32
    %126 = vector.broadcast %cst_53 : f32 to vector<32x64xf32>
    %127 = arith.mulf %126, %125 : vector<32x64xf32>
    %128 = arith.mulf %115, %127 : vector<32x64xf32>
    %c0_54 = arith.constant 0 : index
    %c0_55 = arith.constant 0 : index
    %c0_56 = arith.constant 0 : index
    %129 = vector.load %arg6[%c0_54, %c0_55, %c0_56] : memref<2x64x32xf32, #tpu.memory_space<vmem>>, vector<1x64x32xf32>
    %130 = vector.shape_cast %129 : vector<1x64x32xf32> to vector<64x32xf32>
    %cst_57 = arith.constant dense<0.000000e+00> : vector<32x32xf32>
    %131 = tpu.matmul %128, %130, %cst_57 {dimension_numbers = #tpu.dot_dimension_numbers<[1], [0], [0], [1], [0, 0, 1, 1], [], []>} : vector<32x64xf32>, vector<64x32xf32>, vector<32x32xf32> -> vector<32x32xf32>
    %c0_58 = arith.constant 0 : index
    %c3 = arith.constant 3 : index
    %c0_59 = arith.constant 0 : index
    %132 = vector.load %arg7[%c0_58, %c3, %c0_59] : memref<2x8x96xf32, #tpu.memory_space<vmem>>, vector<1x1x32xf32>
    %133 = vector.shape_cast %132 : vector<1x1x32xf32> to vector<1x32xf32>
    %134 = vector.broadcast %133 : vector<1x32xf32> to vector<32x32xf32>
    %135 = arith.addf %131, %134 : vector<32x32xf32>
    %136 = arith.addf %108, %135 : vector<32x32xf32>
    %c0_60 = arith.constant 0 : index
    %c6 = arith.constant 6 : index
    %c0_61 = arith.constant 0 : index
    %137 = vector.load %arg7[%c0_60, %c6, %c0_61] : memref<2x8x96xf32, #tpu.memory_space<vmem>>, vector<1x1x32xf32>
    %138 = vector.shape_cast %137 : vector<1x1x32xf32> to vector<1x32xf32>
    %c0_62 = arith.constant 0 : index
    %c7 = arith.constant 7 : index
    %c0_63 = arith.constant 0 : index
    %139 = vector.load %arg7[%c0_62, %c7, %c0_63] : memref<2x8x96xf32, #tpu.memory_space<vmem>>, vector<1x1x32xf32>
    %140 = vector.shape_cast %139 : vector<1x1x32xf32> to vector<1x32xf32>
    %cst_64 = arith.constant dense<0.000000e+00> : vector<32xf32>
    %141 = vector.multi_reduction <add>, %136, %cst_64 [1] : vector<32x32xf32> to vector<32xf32>
    %142 = vector.shape_cast %141 : vector<32xf32> to vector<32x1xf32>
    %cst_65 = arith.constant 3.200000e+01 : f32
    %143 = vector.broadcast %cst_65 : f32 to vector<32x1xf32>
    %144 = arith.divf %142, %143 : vector<32x1xf32>
    %145 = vector.broadcast %144 : vector<32x1xf32> to vector<32x32xf32>
    %146 = arith.subf %136, %145 : vector<32x32xf32>
    %147 = arith.mulf %146, %146 : vector<32x32xf32>
    %cst_66 = arith.constant dense<0.000000e+00> : vector<32xf32>
    %148 = vector.multi_reduction <add>, %147, %cst_66 [1] : vector<32x32xf32> to vector<32xf32>
    %149 = vector.shape_cast %148 : vector<32xf32> to vector<32x1xf32>
    %cst_67 = arith.constant 3.200000e+01 : f32
    %150 = vector.broadcast %cst_67 : f32 to vector<32x1xf32>
    %151 = arith.divf %149, %150 : vector<32x1xf32>
    %152 = vector.broadcast %144 : vector<32x1xf32> to vector<32x32xf32>
    %153 = arith.subf %136, %152 : vector<32x32xf32>
    %cst_68 = arith.constant 9.99999974E-6 : f32
    %154 = vector.broadcast %cst_68 : f32 to vector<32x1xf32>
    %155 = arith.addf %151, %154 : vector<32x1xf32>
    %156 = math.rsqrt %155 : vector<32x1xf32>
    %157 = vector.broadcast %156 : vector<32x1xf32> to vector<32x32xf32>
    %158 = arith.mulf %153, %157 : vector<32x32xf32>
    %159 = vector.broadcast %138 : vector<1x32xf32> to vector<32x32xf32>
    %160 = arith.mulf %158, %159 : vector<32x32xf32>
    %161 = vector.broadcast %140 : vector<1x32xf32> to vector<32x32xf32>
    %162 = arith.addf %160, %161 : vector<32x32xf32>
    %c1_69 = arith.constant 1 : index
    %c0_70 = arith.constant 0 : index
    %c0_71 = arith.constant 0 : index
    %163 = vector.load %arg3[%c1_69, %c0_70, %c0_71] : memref<2x32x96xf32, #tpu.memory_space<vmem>>, vector<1x32x96xf32>
    %164 = vector.shape_cast %163 : vector<1x32x96xf32> to vector<32x96xf32>
    %cst_72 = arith.constant dense<0.000000e+00> : vector<32x96xf32>
    %165 = tpu.matmul %162, %164, %cst_72 {dimension_numbers = #tpu.dot_dimension_numbers<[1], [0], [0], [1], [0, 0, 1, 1], [], []>} : vector<32x32xf32>, vector<32x96xf32>, vector<32x96xf32> -> vector<32x96xf32>
    %c1_73 = arith.constant 1 : index
    %c0_74 = arith.constant 0 : index
    %c0_75 = arith.constant 0 : index
    %166 = vector.load %arg7[%c1_73, %c0_74, %c0_75] : memref<2x8x96xf32, #tpu.memory_space<vmem>>, vector<1x1x96xf32>
    %167 = vector.shape_cast %166 : vector<1x1x96xf32> to vector<1x96xf32>
    %168 = vector.broadcast %167 : vector<1x96xf32> to vector<32x96xf32>
    %169 = arith.addf %165, %168 : vector<32x96xf32>
    %170 = vector.extract_strided_slice %169 {offsets = [0, 0], sizes = [32, 32], strides = [1, 1]} : vector<32x96xf32> to vector<32x32xf32>
    %171 = vector.shape_cast %170 : vector<32x32xf32> to vector<2x16x32xf32>
    %172 = vector.extract_strided_slice %169 {offsets = [0, 32], sizes = [32, 32], strides = [1, 1]} : vector<32x96xf32> to vector<32x32xf32>
    %173 = vector.shape_cast %172 : vector<32x32xf32> to vector<2x16x32xf32>
    %174 = vector.extract_strided_slice %169 {offsets = [0, 64], sizes = [32, 32], strides = [1, 1]} : vector<32x96xf32> to vector<32x32xf32>
    %175 = vector.shape_cast %174 : vector<32x32xf32> to vector<2x16x32xf32>
    %cst_76 = arith.constant 0.000000e+00 : f32
    %176 = vector.broadcast %cst_76 : f32 to vector<32x32xf32>
    %177 = vector.extract_strided_slice %171 {offsets = [0, 0, 0], sizes = [2, 16, 16], strides = [1, 1, 1]} : vector<2x16x32xf32> to vector<2x16x16xf32>
    %178 = vector.extract_strided_slice %173 {offsets = [0, 0, 0], sizes = [2, 16, 16], strides = [1, 1, 1]} : vector<2x16x32xf32> to vector<2x16x16xf32>
    %179 = vector.extract_strided_slice %175 {offsets = [0, 0, 0], sizes = [2, 16, 16], strides = [1, 1, 1]} : vector<2x16x32xf32> to vector<2x16x16xf32>
    "tpu.trace_start"() <{level = 10 : i32, message = "bqd,bkd->bqk"}> : () -> ()
    %cst_77 = arith.constant dense<0.000000e+00> : vector<2x16x16xf32>
    %180 = tpu.matmul %177, %178, %cst_77 {dimension_numbers = #tpu.dot_dimension_numbers<[2], [2], [1], [1], [0, 0, 0, 1, 1, 1], [0], [0]>} : vector<2x16x16xf32>, vector<2x16x16xf32>, vector<2x16x16xf32> -> vector<2x16x16xf32>
    "tpu.trace_stop"() : () -> ()
    %cst_78 = arith.constant 2.500000e-01 : f32
    %181 = vector.broadcast %cst_78 : f32 to vector<2x16x16xf32>
    %182 = arith.mulf %180, %181 : vector<2x16x16xf32>
    %183 = arith.addf %182, %14 : vector<2x16x16xf32>
    %cst_79 = arith.constant dense<0xFF800000> : vector<2x16xf32>
    %184 = vector.multi_reduction <maximumf>, %183, %cst_79 [2] : vector<2x16x16xf32> to vector<2x16xf32>
    %185 = vector.shape_cast %184 : vector<2x16xf32> to vector<2x16x1xf32>
    %186 = vector.broadcast %185 : vector<2x16x1xf32> to vector<2x16x16xf32>
    %187 = arith.subf %183, %186 : vector<2x16x16xf32>
    %188 = math.exp %187 : vector<2x16x16xf32>
    %cst_80 = arith.constant dense<0.000000e+00> : vector<2x16xf32>
    %189 = vector.multi_reduction <add>, %188, %cst_80 [2] : vector<2x16x16xf32> to vector<2x16xf32>
    %190 = vector.shape_cast %189 : vector<2x16xf32> to vector<2x16x1xf32>
    %191 = tpu.reciprocal %190 {approx = true} : vector<2x16x1xf32> -> vector<2x16x1xf32>
    %192 = vector.broadcast %191 : vector<2x16x1xf32> to vector<2x16x16xf32>
    %193 = arith.mulf %188, %192 : vector<2x16x16xf32>
    "tpu.trace_start"() <{level = 10 : i32, message = "bqk,bkd->bqd"}> : () -> ()
    %cst_81 = arith.constant dense<0.000000e+00> : vector<2x16x16xf32>
    %194 = tpu.matmul %193, %179, %cst_81 {dimension_numbers = #tpu.dot_dimension_numbers<[2], [1], [1], [2], [0, 0, 0, 1, 1, 2], [0], [0]>} : vector<2x16x16xf32>, vector<2x16x16xf32>, vector<2x16x16xf32> -> vector<2x16x16xf32>
    "tpu.trace_stop"() : () -> ()
    %195 = vector.shape_cast %194 : vector<2x16x16xf32> to vector<32x16xf32>
    %c1_82 = arith.constant 1 : index
    %c0_83 = arith.constant 0 : index
    %c0_84 = arith.constant 0 : index
    %196 = vector.load %arg4[%c1_82, %c0_83, %c0_84] : memref<2x32x32xf32, #tpu.memory_space<vmem>>, vector<1x16x32xf32>
    %197 = vector.shape_cast %196 : vector<1x16x32xf32> to vector<16x32xf32>
    %cst_85 = arith.constant dense<0.000000e+00> : vector<32x32xf32>
    %198 = tpu.matmul %195, %197, %cst_85 {dimension_numbers = #tpu.dot_dimension_numbers<[1], [0], [0], [1], [0, 0, 1, 1], [], []>} : vector<32x16xf32>, vector<16x32xf32>, vector<32x32xf32> -> vector<32x32xf32>
    %199 = arith.addf %176, %198 : vector<32x32xf32>
    %200 = vector.extract_strided_slice %171 {offsets = [0, 0, 16], sizes = [2, 16, 16], strides = [1, 1, 1]} : vector<2x16x32xf32> to vector<2x16x16xf32>
    %201 = vector.extract_strided_slice %173 {offsets = [0, 0, 16], sizes = [2, 16, 16], strides = [1, 1, 1]} : vector<2x16x32xf32> to vector<2x16x16xf32>
    %202 = vector.extract_strided_slice %175 {offsets = [0, 0, 16], sizes = [2, 16, 16], strides = [1, 1, 1]} : vector<2x16x32xf32> to vector<2x16x16xf32>
    "tpu.trace_start"() <{level = 10 : i32, message = "bqd,bkd->bqk"}> : () -> ()
    %cst_86 = arith.constant dense<0.000000e+00> : vector<2x16x16xf32>
    %203 = tpu.matmul %200, %201, %cst_86 {dimension_numbers = #tpu.dot_dimension_numbers<[2], [2], [1], [1], [0, 0, 0, 1, 1, 1], [0], [0]>} : vector<2x16x16xf32>, vector<2x16x16xf32>, vector<2x16x16xf32> -> vector<2x16x16xf32>
    "tpu.trace_stop"() : () -> ()
    %cst_87 = arith.constant 2.500000e-01 : f32
    %204 = vector.broadcast %cst_87 : f32 to vector<2x16x16xf32>
    %205 = arith.mulf %203, %204 : vector<2x16x16xf32>
    %206 = arith.addf %205, %14 : vector<2x16x16xf32>
    %cst_88 = arith.constant dense<0xFF800000> : vector<2x16xf32>
    %207 = vector.multi_reduction <maximumf>, %206, %cst_88 [2] : vector<2x16x16xf32> to vector<2x16xf32>
    %208 = vector.shape_cast %207 : vector<2x16xf32> to vector<2x16x1xf32>
    %209 = vector.broadcast %208 : vector<2x16x1xf32> to vector<2x16x16xf32>
    %210 = arith.subf %206, %209 : vector<2x16x16xf32>
    %211 = math.exp %210 : vector<2x16x16xf32>
    %cst_89 = arith.constant dense<0.000000e+00> : vector<2x16xf32>
    %212 = vector.multi_reduction <add>, %211, %cst_89 [2] : vector<2x16x16xf32> to vector<2x16xf32>
    %213 = vector.shape_cast %212 : vector<2x16xf32> to vector<2x16x1xf32>
    %214 = tpu.reciprocal %213 {approx = true} : vector<2x16x1xf32> -> vector<2x16x1xf32>
    %215 = vector.broadcast %214 : vector<2x16x1xf32> to vector<2x16x16xf32>
    %216 = arith.mulf %211, %215 : vector<2x16x16xf32>
    "tpu.trace_start"() <{level = 10 : i32, message = "bqk,bkd->bqd"}> : () -> ()
    %cst_90 = arith.constant dense<0.000000e+00> : vector<2x16x16xf32>
    %217 = tpu.matmul %216, %202, %cst_90 {dimension_numbers = #tpu.dot_dimension_numbers<[2], [1], [1], [2], [0, 0, 0, 1, 1, 2], [0], [0]>} : vector<2x16x16xf32>, vector<2x16x16xf32>, vector<2x16x16xf32> -> vector<2x16x16xf32>
    "tpu.trace_stop"() : () -> ()
    %218 = vector.shape_cast %217 : vector<2x16x16xf32> to vector<32x16xf32>
    %c1_91 = arith.constant 1 : index
    %c16_92 = arith.constant 16 : index
    %c0_93 = arith.constant 0 : index
    %219 = vector.load %arg4[%c1_91, %c16_92, %c0_93] : memref<2x32x32xf32, #tpu.memory_space<vmem>>, vector<1x16x32xf32>
    %220 = vector.shape_cast %219 : vector<1x16x32xf32> to vector<16x32xf32>
    %cst_94 = arith.constant dense<0.000000e+00> : vector<32x32xf32>
    %221 = tpu.matmul %218, %220, %cst_94 {dimension_numbers = #tpu.dot_dimension_numbers<[1], [0], [0], [1], [0, 0, 1, 1], [], []>} : vector<32x16xf32>, vector<16x32xf32>, vector<32x32xf32> -> vector<32x32xf32>
    %222 = arith.addf %199, %221 : vector<32x32xf32>
    %c1_95 = arith.constant 1 : index
    %c1_96 = arith.constant 1 : index
    %c0_97 = arith.constant 0 : index
    %223 = vector.load %arg7[%c1_95, %c1_96, %c0_97] : memref<2x8x96xf32, #tpu.memory_space<vmem>>, vector<1x1x32xf32>
    %224 = vector.shape_cast %223 : vector<1x1x32xf32> to vector<1x32xf32>
    %225 = vector.broadcast %224 : vector<1x32xf32> to vector<32x32xf32>
    %226 = arith.addf %222, %225 : vector<32x32xf32>
    %227 = arith.addf %162, %226 : vector<32x32xf32>
    %c1_98 = arith.constant 1 : index
    %c4_99 = arith.constant 4 : index
    %c0_100 = arith.constant 0 : index
    %228 = vector.load %arg7[%c1_98, %c4_99, %c0_100] : memref<2x8x96xf32, #tpu.memory_space<vmem>>, vector<1x1x32xf32>
    %229 = vector.shape_cast %228 : vector<1x1x32xf32> to vector<1x32xf32>
    %c1_101 = arith.constant 1 : index
    %c5_102 = arith.constant 5 : index
    %c0_103 = arith.constant 0 : index
    %230 = vector.load %arg7[%c1_101, %c5_102, %c0_103] : memref<2x8x96xf32, #tpu.memory_space<vmem>>, vector<1x1x32xf32>
    %231 = vector.shape_cast %230 : vector<1x1x32xf32> to vector<1x32xf32>
    %cst_104 = arith.constant dense<0.000000e+00> : vector<32xf32>
    %232 = vector.multi_reduction <add>, %227, %cst_104 [1] : vector<32x32xf32> to vector<32xf32>
    %233 = vector.shape_cast %232 : vector<32xf32> to vector<32x1xf32>
    %cst_105 = arith.constant 3.200000e+01 : f32
    %234 = vector.broadcast %cst_105 : f32 to vector<32x1xf32>
    %235 = arith.divf %233, %234 : vector<32x1xf32>
    %236 = vector.broadcast %235 : vector<32x1xf32> to vector<32x32xf32>
    %237 = arith.subf %227, %236 : vector<32x32xf32>
    %238 = arith.mulf %237, %237 : vector<32x32xf32>
    %cst_106 = arith.constant dense<0.000000e+00> : vector<32xf32>
    %239 = vector.multi_reduction <add>, %238, %cst_106 [1] : vector<32x32xf32> to vector<32xf32>
    %240 = vector.shape_cast %239 : vector<32xf32> to vector<32x1xf32>
    %cst_107 = arith.constant 3.200000e+01 : f32
    %241 = vector.broadcast %cst_107 : f32 to vector<32x1xf32>
    %242 = arith.divf %240, %241 : vector<32x1xf32>
    %243 = vector.broadcast %235 : vector<32x1xf32> to vector<32x32xf32>
    %244 = arith.subf %227, %243 : vector<32x32xf32>
    %cst_108 = arith.constant 9.99999974E-6 : f32
    %245 = vector.broadcast %cst_108 : f32 to vector<32x1xf32>
    %246 = arith.addf %242, %245 : vector<32x1xf32>
    %247 = math.rsqrt %246 : vector<32x1xf32>
    %248 = vector.broadcast %247 : vector<32x1xf32> to vector<32x32xf32>
    %249 = arith.mulf %244, %248 : vector<32x32xf32>
    %250 = vector.broadcast %229 : vector<1x32xf32> to vector<32x32xf32>
    %251 = arith.mulf %249, %250 : vector<32x32xf32>
    %252 = vector.broadcast %231 : vector<1x32xf32> to vector<32x32xf32>
    %253 = arith.addf %251, %252 : vector<32x32xf32>
    %c1_109 = arith.constant 1 : index
    %c0_110 = arith.constant 0 : index
    %c0_111 = arith.constant 0 : index
    %254 = vector.load %arg5[%c1_109, %c0_110, %c0_111] : memref<2x32x64xf32, #tpu.memory_space<vmem>>, vector<1x32x64xf32>
    %255 = vector.shape_cast %254 : vector<1x32x64xf32> to vector<32x64xf32>
    %cst_112 = arith.constant dense<0.000000e+00> : vector<32x64xf32>
    %256 = tpu.matmul %253, %255, %cst_112 {dimension_numbers = #tpu.dot_dimension_numbers<[1], [0], [0], [1], [0, 0, 1, 1], [], []>} : vector<32x32xf32>, vector<32x64xf32>, vector<32x64xf32> -> vector<32x64xf32>
    %c1_113 = arith.constant 1 : index
    %c2_114 = arith.constant 2 : index
    %c0_115 = arith.constant 0 : index
    %257 = vector.load %arg7[%c1_113, %c2_114, %c0_115] : memref<2x8x96xf32, #tpu.memory_space<vmem>>, vector<1x1x64xf32>
    %258 = vector.shape_cast %257 : vector<1x1x64xf32> to vector<1x64xf32>
    %259 = vector.broadcast %258 : vector<1x64xf32> to vector<32x64xf32>
    %260 = arith.addf %256, %259 : vector<32x64xf32>
    %261 = arith.mulf %260, %260 : vector<32x64xf32>
    %262 = arith.mulf %260, %261 : vector<32x64xf32>
    %cst_116 = arith.constant 4.471500e-02 : f32
    %263 = vector.broadcast %cst_116 : f32 to vector<32x64xf32>
    %264 = arith.mulf %263, %262 : vector<32x64xf32>
    %265 = arith.addf %260, %264 : vector<32x64xf32>
    %cst_117 = arith.constant 0.797884583 : f32
    %266 = vector.broadcast %cst_117 : f32 to vector<32x64xf32>
    %267 = arith.mulf %266, %265 : vector<32x64xf32>
    %268 = math.tanh %267 : vector<32x64xf32>
    %cst_118 = arith.constant 1.000000e+00 : f32
    %269 = vector.broadcast %cst_118 : f32 to vector<32x64xf32>
    %270 = arith.addf %269, %268 : vector<32x64xf32>
    %cst_119 = arith.constant 5.000000e-01 : f32
    %271 = vector.broadcast %cst_119 : f32 to vector<32x64xf32>
    %272 = arith.mulf %271, %270 : vector<32x64xf32>
    %273 = arith.mulf %260, %272 : vector<32x64xf32>
    %c1_120 = arith.constant 1 : index
    %c0_121 = arith.constant 0 : index
    %c0_122 = arith.constant 0 : index
    %274 = vector.load %arg6[%c1_120, %c0_121, %c0_122] : memref<2x64x32xf32, #tpu.memory_space<vmem>>, vector<1x64x32xf32>
    %275 = vector.shape_cast %274 : vector<1x64x32xf32> to vector<64x32xf32>
    %cst_123 = arith.constant dense<0.000000e+00> : vector<32x32xf32>
    %276 = tpu.matmul %273, %275, %cst_123 {dimension_numbers = #tpu.dot_dimension_numbers<[1], [0], [0], [1], [0, 0, 1, 1], [], []>} : vector<32x64xf32>, vector<64x32xf32>, vector<32x32xf32> -> vector<32x32xf32>
    %c1_124 = arith.constant 1 : index
    %c3_125 = arith.constant 3 : index
    %c0_126 = arith.constant 0 : index
    %277 = vector.load %arg7[%c1_124, %c3_125, %c0_126] : memref<2x8x96xf32, #tpu.memory_space<vmem>>, vector<1x1x32xf32>
    %278 = vector.shape_cast %277 : vector<1x1x32xf32> to vector<1x32xf32>
    %279 = vector.broadcast %278 : vector<1x32xf32> to vector<32x32xf32>
    %280 = arith.addf %276, %279 : vector<32x32xf32>
    %281 = arith.addf %253, %280 : vector<32x32xf32>
    %c1_127 = arith.constant 1 : index
    %c6_128 = arith.constant 6 : index
    %c0_129 = arith.constant 0 : index
    %282 = vector.load %arg7[%c1_127, %c6_128, %c0_129] : memref<2x8x96xf32, #tpu.memory_space<vmem>>, vector<1x1x32xf32>
    %283 = vector.shape_cast %282 : vector<1x1x32xf32> to vector<1x32xf32>
    %c1_130 = arith.constant 1 : index
    %c7_131 = arith.constant 7 : index
    %c0_132 = arith.constant 0 : index
    %284 = vector.load %arg7[%c1_130, %c7_131, %c0_132] : memref<2x8x96xf32, #tpu.memory_space<vmem>>, vector<1x1x32xf32>
    %285 = vector.shape_cast %284 : vector<1x1x32xf32> to vector<1x32xf32>
    %cst_133 = arith.constant dense<0.000000e+00> : vector<32xf32>
    %286 = vector.multi_reduction <add>, %281, %cst_133 [1] : vector<32x32xf32> to vector<32xf32>
    %287 = vector.shape_cast %286 : vector<32xf32> to vector<32x1xf32>
    %cst_134 = arith.constant 3.200000e+01 : f32
    %288 = vector.broadcast %cst_134 : f32 to vector<32x1xf32>
    %289 = arith.divf %287, %288 : vector<32x1xf32>
    %290 = vector.broadcast %289 : vector<32x1xf32> to vector<32x32xf32>
    %291 = arith.subf %281, %290 : vector<32x32xf32>
    %292 = arith.mulf %291, %291 : vector<32x32xf32>
    %cst_135 = arith.constant dense<0.000000e+00> : vector<32xf32>
    %293 = vector.multi_reduction <add>, %292, %cst_135 [1] : vector<32x32xf32> to vector<32xf32>
    %294 = vector.shape_cast %293 : vector<32xf32> to vector<32x1xf32>
    %cst_136 = arith.constant 3.200000e+01 : f32
    %295 = vector.broadcast %cst_136 : f32 to vector<32x1xf32>
    %296 = arith.divf %294, %295 : vector<32x1xf32>
    %297 = vector.broadcast %289 : vector<32x1xf32> to vector<32x32xf32>
    %298 = arith.subf %281, %297 : vector<32x32xf32>
    %cst_137 = arith.constant 9.99999974E-6 : f32
    %299 = vector.broadcast %cst_137 : f32 to vector<32x1xf32>
    %300 = arith.addf %296, %299 : vector<32x1xf32>
    %301 = math.rsqrt %300 : vector<32x1xf32>
    %302 = vector.broadcast %301 : vector<32x1xf32> to vector<32x32xf32>
    %303 = arith.mulf %298, %302 : vector<32x32xf32>
    %304 = vector.broadcast %283 : vector<1x32xf32> to vector<32x32xf32>
    %305 = arith.mulf %303, %304 : vector<32x32xf32>
    %306 = vector.broadcast %285 : vector<1x32xf32> to vector<32x32xf32>
    %307 = arith.addf %305, %306 : vector<32x32xf32>
    %c0_138 = arith.constant 0 : index
    %c0_139 = arith.constant 0 : index
    %308 = vector.load %arg8[%c0_138, %c0_139] : memref<4x32xf32, #tpu.memory_space<vmem>>, vector<1x32xf32>
    %c1_140 = arith.constant 1 : index
    %c0_141 = arith.constant 0 : index
    %309 = vector.load %arg8[%c1_140, %c0_141] : memref<4x32xf32, #tpu.memory_space<vmem>>, vector<1x32xf32>
    %cst_142 = arith.constant dense<0.000000e+00> : vector<32xf32>
    %310 = vector.multi_reduction <add>, %307, %cst_142 [1] : vector<32x32xf32> to vector<32xf32>
    %311 = vector.shape_cast %310 : vector<32xf32> to vector<32x1xf32>
    %cst_143 = arith.constant 3.200000e+01 : f32
    %312 = vector.broadcast %cst_143 : f32 to vector<32x1xf32>
    %313 = arith.divf %311, %312 : vector<32x1xf32>
    %314 = vector.broadcast %313 : vector<32x1xf32> to vector<32x32xf32>
    %315 = arith.subf %307, %314 : vector<32x32xf32>
    %316 = arith.mulf %315, %315 : vector<32x32xf32>
    %cst_144 = arith.constant dense<0.000000e+00> : vector<32xf32>
    %317 = vector.multi_reduction <add>, %316, %cst_144 [1] : vector<32x32xf32> to vector<32xf32>
    %318 = vector.shape_cast %317 : vector<32xf32> to vector<32x1xf32>
    %cst_145 = arith.constant 3.200000e+01 : f32
    %319 = vector.broadcast %cst_145 : f32 to vector<32x1xf32>
    %320 = arith.divf %318, %319 : vector<32x1xf32>
    %321 = vector.broadcast %313 : vector<32x1xf32> to vector<32x32xf32>
    %322 = arith.subf %307, %321 : vector<32x32xf32>
    %cst_146 = arith.constant 9.99999974E-6 : f32
    %323 = vector.broadcast %cst_146 : f32 to vector<32x1xf32>
    %324 = arith.addf %320, %323 : vector<32x1xf32>
    %325 = math.rsqrt %324 : vector<32x1xf32>
    %326 = vector.broadcast %325 : vector<32x1xf32> to vector<32x32xf32>
    %327 = arith.mulf %322, %326 : vector<32x32xf32>
    %328 = vector.broadcast %308 : vector<1x32xf32> to vector<32x32xf32>
    %329 = arith.mulf %327, %328 : vector<32x32xf32>
    %330 = vector.broadcast %309 : vector<1x32xf32> to vector<32x32xf32>
    %331 = arith.addf %329, %330 : vector<32x32xf32>
    %332 = vector.shape_cast %331 : vector<32x32xf32> to vector<2x16x32xf32>
    %c2_147 = arith.constant 2 : index
    %c0_148 = arith.constant 0 : index
    %333 = vector.load %arg8[%c2_147, %c0_148] : memref<4x32xf32, #tpu.memory_space<vmem>>, vector<1x32xf32>
    %334 = vector.shape_cast %333 : vector<1x32xf32> to vector<1x1x32xf32>
    %335 = vector.broadcast %334 : vector<1x1x32xf32> to vector<2x16x32xf32>
    %336 = arith.mulf %332, %335 : vector<2x16x32xf32>
    %cst_149 = arith.constant dense<0.000000e+00> : vector<2x16xf32>
    %337 = vector.multi_reduction <add>, %336, %cst_149 [2] : vector<2x16x32xf32> to vector<2x16xf32>
    %c3_150 = arith.constant 3 : index
    %c0_151 = arith.constant 0 : index
    %338 = vector.load %arg8[%c3_150, %c0_151] : memref<4x32xf32, #tpu.memory_space<vmem>>, vector<1x1xf32>
    %339 = vector.broadcast %338 : vector<1x1xf32> to vector<2x16xf32>
    %340 = arith.addf %337, %339 : vector<2x16xf32>
    %c0_152 = arith.constant 0 : index
    %c0_153 = arith.constant 0 : index
    %c0_154 = arith.constant 0 : index
    %341 = vector.load %arg9[%c0_152, %c0_153, %c0_154] : memref<1x2x16xf32, #tpu.memory_space<vmem>>, vector<1x2x16xf32>
    %342 = vector.shape_cast %341 : vector<1x2x16xf32> to vector<2x16xf32>
    %343 = vector.shape_cast %340 : vector<2x16xf32> to vector<1x2x16xf32>
    tpu.vector_store %arg9[%c0_152, %c0_153, %c0_154], %343 {strides = array<i32>} : memref<1x2x16xf32, #tpu.memory_space<vmem>>, vector<1x2x16xf32>,
    return
  }
  func.func @transform_0(%arg0: i32) -> (i32, i32, i32, i32) {
    %c0_i32 = arith.constant 0 : i32
    %c0_i32_0 = arith.constant 0 : i32
    %c0_i32_1 = arith.constant 0 : i32
    %c0_i32_2 = arith.constant 0 : i32
    return %arg0, %c0_i32, %c0_i32_0, %c0_i32_1 : i32, i32, i32, i32
  }
  func.func @transform_1(%arg0: i32) -> (i32, i32, i32) {
    %c0_i32 = arith.constant 0 : i32
    %c0_i32_0 = arith.constant 0 : i32
    %c0_i32_1 = arith.constant 0 : i32
    return %arg0, %c0_i32, %c0_i32_0 : i32, i32, i32
  }
  func.func @transform_2(%arg0: i32) -> (i32, i32, i32) {
    %c0_i32 = arith.constant 0 : i32
    %c0_i32_0 = arith.constant 0 : i32
    %c0_i32_1 = arith.constant 0 : i32
    %c0_i32_2 = arith.constant 0 : i32
    return %c0_i32, %c0_i32_0, %c0_i32_1 : i32, i32, i32
  }
  func.func @transform_3(%arg0: i32) -> (i32, i32, i32) {
    %c0_i32 = arith.constant 0 : i32
    %c0_i32_0 = arith.constant 0 : i32
    %c0_i32_1 = arith.constant 0 : i32
    %c0_i32_2 = arith.constant 0 : i32
    return %c0_i32, %c0_i32_0, %c0_i32_1 : i32, i32, i32
  }
  func.func @transform_4(%arg0: i32) -> (i32, i32, i32) {
    %c0_i32 = arith.constant 0 : i32
    %c0_i32_0 = arith.constant 0 : i32
    %c0_i32_1 = arith.constant 0 : i32
    %c0_i32_2 = arith.constant 0 : i32
    return %c0_i32, %c0_i32_0, %c0_i32_1 : i32, i32, i32
  }
  func.func @transform_5(%arg0: i32) -> (i32, i32, i32) {
    %c0_i32 = arith.constant 0 : i32
    %c0_i32_0 = arith.constant 0 : i32
    %c0_i32_1 = arith.constant 0 : i32
    %c0_i32_2 = arith.constant 0 : i32
    return %c0_i32, %c0_i32_0, %c0_i32_1 : i32, i32, i32
  }
  func.func @transform_6(%arg0: i32) -> (i32, i32, i32) {
    %c0_i32 = arith.constant 0 : i32
    %c0_i32_0 = arith.constant 0 : i32
    %c0_i32_1 = arith.constant 0 : i32
    %c0_i32_2 = arith.constant 0 : i32
    return %c0_i32, %c0_i32_0, %c0_i32_1 : i32, i32, i32
  }
  func.func @transform_7(%arg0: i32) -> (i32, i32) {
    %c0_i32 = arith.constant 0 : i32
    %c0_i32_0 = arith.constant 0 : i32
    %c0_i32_1 = arith.constant 0 : i32
    return %c0_i32, %c0_i32_0 : i32, i32
  }
  func.func @transform_8(%arg0: i32) -> (i32, i32, i32) {
    %c0_i32 = arith.constant 0 : i32
    %c0_i32_0 = arith.constant 0 : i32
    %c0_i32_1 = arith.constant 0 : i32
    return %arg0, %c0_i32, %c0_i32_0 : i32, i32, i32
  }
}

</mosaic_0001>

<bundles_post_ra>
// kernel: forward.1
= control target key start
LH: loop header
LB: loop body
LE: loop exit
PB: predicated region body
PF: predicated region fallthrough
CT: control target
= control target key end

     0   :  { %s4626_s27 = smov 0   ;;  %s5234_s0 = inlined_call_operand.vmem [shape: f32[2,2,16,32], index: 0, kind: input, shape index: {}]   ;;  %s5235_s1 = inlined_call_operand.vmem [shape: f32[2,2,16], index: 1, kind: input, shape index: {}]   ;;  %s5236_s2 = inlined_call_operand.vmem [shape: f32[2,32,96], index: 2, kind: input, shape index: {}]   ;;  %s5237_s3 = inlined_call_operand.vmem [shape: f32[2,32,32], index: 3, kind: input, shape index: {}]   ;;  %s5238_s4 = inlined_call_operand.vmem [shape: f32[2,32,64], index: 4, kind: input, shape index: {}]   ;;  %s5239_s5 = inlined_call_operand.vmem [shape: f32[2,64,32], index: 5, kind: input, shape index: {}]   ;;  %s5240_s6 = inlined_call_operand.vmem [shape: f32[2,8,96], index: 6, kind: input, shape index: {}]   ;;  %s5241_s7 = inlined_call_operand.vmem [shape: f32[4,32], index: 7, kind: input, shape index: {}]   ;;  %s5242_s8 = inlined_call_operand.vmem [shape: f32[2,2,16], index: 8, kind: output, shape index: {}]  }
   0x1 LB: > { %s3636_s28 = sadd.s32 4294967295, %s4571_s27   ;;  %p3640_p0 = scmp.ge.s32.totalorder %s4571_s27, 1  ;;  %s4571_s27 = sphi %s4626_s27, %s18_s27  }
   0x2   : > { %p271_p1 = scmp.lt.s32.totalorder %s4571_s27, 3 }
   0x4   : > { %p272_p2 = pnand %p3640_p0, %p271_p1 }
   0x5   : > { %v383_v0 = vld [vmem:[%s5236_s2] sm:$0xff] (!%p272_p2)  ;;  %v384_v1 = vld [vmem:[%s5236_s2 + $0x8] sm:$0xff] (!%p272_p2)  ;;  %v385_v2 = vld [vmem:[%s5236_s2 + $0x10] sm:$0xff] (!%p272_p2)  ;;  %p308_p3 = scmp.lt.s32.totalorder (!%p272_p2), %s3636_s28, 1  ;;  %vm392_vm0 = vcmask (!%p272_p2), 261120   ;;  %vm496_vm1 = vcmask (!%p272_p2), 130048   ;;  %v321_v30 = vlaneseq (!%p272_p2) }
   0x6   : > { %275 = sbr.rel (%p272_p2) target bundleno = 6440 (0x1928), region = 52  ;;  %v4179_v3 = vpack.c.bf16 (!%p272_p2), %v384_v1, %v383_v0  ;;  %v386_v4 = vld [vmem:[%s5236_s2 + $0x18] sm:$0xff] (!%p272_p2)  ;;  %v3645_v10 = vld [vmem:[%s5240_s6] ss:$0 sm:$0xff] (!%p272_p2)  ;;  %s4573_s21 = smov (!%p272_p2), 96   ;;  %vm4697_vm2 = vmpackc.low (!%p272_p2), %vm496_vm1, %vm496_vm1  ;;  %v4575_v37 = vmov (!%p272_p2), 0  }
   0x7   : > { %v4183_v5 = vpack.c.bf16 (!%p272_p2), %v386_v4, %v385_v2  ;;  %v4574_v31 = vmov (!%p272_p2), 1966171168   ;;  %v4719_v34 = vshrl.u32 (!%p272_p2), %v321_v30, 7  ;;  %v4723_v45 = vand.u32 (!%p272_p2), 127, %v321_v30  ;;  %s4577_s26 = smov (!%p272_p2), 64   ;;  %s4578_s29 = smov (!%p272_p2), 80  }
   0x8   : > { %4180 = vmatprep.subr.bf16.mxu1 (!%p272_p2), %v4179_v3  ;;  %v332_v32 = vunpack.c.l.s4 (!%p272_p2), %v4574_v31  ;;  %v4576_v52 = vmov (!%p272_p2), -1e+30   ;;  %s4579_s30 = smov (!%p272_p2), 112   ;;  %s4580_s9 = smov (!%p272_p2), 48   ;;  %vm1740_vm14 = vcmask (!%p272_p2), 523264   ;;  %vm3555_vm15 = vcmask (!%p272_p2), 130112  }
   0x9   : > { %4182 = vmatpush3.bf16.msra.mxu1 (!%p272_p2), %v4179_v3  ;;  %v363_v43 = vsub.s32 (!%p272_p2), 0, %v4719_v34  ;;  %v323_v48 = vadd.s32 (!%p272_p2), 8, %v4719_v34  ;;  %vm326_vm6 = vcmp.ge.s32.totalorder (!%p272_p2), %v4719_v34, %v4723_v45 }
   0xa   : > { %4184 = vmatprep.subr.bf16.mxu1 (!%p272_p2), %v4183_v5  ;;  %v333_v35 = vunpack.c.0.s8 (!%p272_p2), %v332_v32 }
   0xb   : > { %vm327_vm8 = vcmp.ge.s32.totalorder (!%p272_p2), %v323_v48, %v4723_v45 }
   0xc   : > { %v336_v36 = vsub.s32 (!%p272_p2), %v333_v35, %v4719_v34 }
   0xd   : > { %s5246_s28 = smov (!%p308_p3, %s3636_s28), 1  ;;  %4186 = vmatpush3.bf16.msra.mxu1 %v4183_v5 }
   0xe   : > { %s3782_s15 = sshll.u32 %s5246_s28, 5  ;;  %s3643_s22 = sshll.u32 %s5246_s28, 1 }
   0xf   : > { %s312_s18 = scalar_lea.vmem %s5234_s0, %s3782_s15  ;;  %s316_s25 = scalar_lea.vmem %s5235_s1, %s3643_s22 }
  0x10   : > { %v4652_v6 = vld [vmem:[%s312_s18] sm:$0xff]  ;;  %v4656_v7 = vld [vmem:[%s312_s18 + $0x8] sm:$0xff]  ;;  %v4658_v8 = vld [vmem:[%s312_s18 + $0x10] sm:$0xff] }
  0x11   : > { %3935 = vmatprep.mubr.msk.f32.mxu1 %vm392_vm0, %v4652_v6  ;;  %v4664_v9 = vld [vmem:[%s312_s18 + $0x18] sm:$0xff]  ;;  %v328_v33 = vld [vmem:[%s316_s25] sm:$0x3] }
  0x12   : > { %3936 = vmatmul.mubr.msk.f32.vlgmr.msra.gmra.mrb[0].mxu1 %vm392_vm0, %v4656_v7  ;;  %vm329_vm3 = vcmp.gt.f32.partialorder %v328_v33, 0.5 }
  0x13   : > { %3938 = vmatprep.mubr.msk.f32.mxu1 %vm392_vm0, %v4658_v8  ;;  %v330_v38 = vsel %vm329_vm3, 1, %v4575_v37 }
  0x14   : > { %v337_v39 = vrot.slane %v330_v38, %v336_v36 }
  0x16   : > { %3939 = vmatmul.mubr.msk.f32.gmra.mrb[2].mxu1 %vm392_vm0, %v4664_v9  ;;  %v345_v40 = vrot.slane %v337_v39, %v336_v36  ;;  %v338_v41 = vcombine.high %v337_v39, %v337_v39 }
  0x18   : > { %vm353_vm4 = vcmp.ne.s32.totalorder %v345_v40, 0  ;;  %v352_v42 = vrot.slane %v338_v41, %v336_v36 }
  0x19   : > { %v359_v44 = vsel %vm353_vm4, 1, %v4575_v37 }
  0x1a   : > { %vm354_vm5 = vcmp.ne.s32.totalorder %v352_v42, 0  ;;  %v364_v46 = vrot.slane %v359_v44, %v363_v43 }
  0x1b   : > { %v360_v47 = vsel %vm354_vm5, 1, %v4575_v37 }
  0x1c   : > { %vm369_vm7 = vcmp.eq.s32.totalorder %v364_v46, 1  ;;  %v368_v49 = vrot.slane %v360_v47, %v363_v43 }
  0x1d   : > { %vm371_vm9 = vmand %vm326_vm6, %vm369_vm7 }
  0x1e   : > { %vm370_vm10 = vcmp.eq.s32.totalorder %v368_v49, 1  ;;  %vm372_vm11 = vmand %vm327_vm8, %vm369_vm7  ;;  %v4729_v53 = vsel %vm371_vm9, 0.0, %v4576_v52 }
  0x1f   : > { %vm373_vm12 = vmand %vm326_vm6, %vm370_vm10  ;;  %v4731_v56 = vsel %vm372_vm11, 0.0, %v4576_v52 }
  0x20   : > { %vm374_vm13 = vmand %vm327_vm8, %vm370_vm10  ;;  %v4734_v60 = vsel %vm373_vm12, 0.0, %v4576_v52 }
  0x21   : > { %v4738_v1 = vsel %vm374_vm13, 0.0, %v4576_v52 }
  0xe5   : > { %v3937_v11 = vpop.f32.mrb[0].mxu1 }
  0xe6   : > { %v4671_v12 = vadd.f32 %v3937_v11, %v3645_v10  ;;  %v471_v13 = vpop.f32.mrb[1].mxu1 }
  0xe7   : > { %v4673_v14 = vadd.f32 %v3645_v10, %v471_v13 }
  0xe9   : > { %v3940_v15 = vpop.f32.mrb[2].mxu1  ;;  %3945 = vmatprep.mubr.msk.f32.mxu1 %vm496_vm1, %v4673_v14  ;;  %v4679_v16 = vpack.i.bf16 %v4671_v12, %v4673_v14 }
  0xea   : > { %v4681_v17 = vadd.f32 %v3940_v15, %v3645_v10  ;;  %v481_v18 = vpop.f32.mrb[3].mxu1 }
  0xeb   : > { %v4683_v19 = vadd.f32 %v3645_v10, %v481_v18  ;;  %4366 = vrot.lane.b32.xlu0 %v4679_v16, %s4573_s21 }
  0xed   : > { %v4689_v20 = vpack.i.bf16 %v4681_v17, %v4683_v19  ;;  %3952 = vmatprep.mubr.msk.f32.mxu0 %vm496_vm1, %v4683_v19 }
  0xef   : > { %4371 = vrot.lane.b32.xlu0 %v4689_v20, %s4573_s21 }
 0x15d   : > { %v4367_v21 = vpop.permute.xlu0 %4366 }
 0x15e   : > { %v4369_v22 = vunpack.i.h.bf16 %v4367_v21  ;;  %v4368_v23 = vunpack.i.l.bf16 %v4367_v21 }
 0x160   : > { %v4187_v25 = vpack.c.bf16 %v4369_v22, %v4368_v23 }
 0x161   : > { %v4372_v26 = vpop.permute.xlu0 %4371 }
 0x162   : > { %v4374_v27 = vunpack.i.h.bf16 %v4372_v26  ;;  %v4373_v28 = vunpack.i.l.bf16 %v4372_v26  ;;  %4189 = vmatprep.subr.msk.bf16.mxu1 %vm4697_vm2, %v4187_v25 }
 0x163   : > { %4192 = vmatpush3.bf16.xpose.msk.msra.mxu1 %vm4697_vm2, %v4187_v25 }
 0x164   : > { %v4193_v29 = vpack.c.bf16 %v4374_v27, %v4373_v28 }
 0x166   : > { %4195 = vmatprep.subr.msk.bf16.mxu0 %vm4697_vm2, %v4193_v29 }
 0x167   : > { %4198 = vmatpush3.bf16.xpose.msk.msra.mxu0 %vm4697_vm2, %v4193_v29 }
 0x16a   : > { %3946 = vmatmul.mubr.msk.f32.vlgmr.msra.gmra.mrb[4].mxu1 %vm496_vm1, %v4671_v12 }
 0x16e   : > { %3953 = vmatmul.mubr.msk.f32.vlgmr.msra.gmra.mrb[0].mxu0 %vm496_vm1, %v4681_v17 }
 0x23d   : > { %v3947_v50 = vpop.f32.mrb[4].mxu1 }
 0x23e   : > { %v571_v51 = vpop.f32.mrb[5].mxu1  ;;  %v670_v54 = vmul.f32 0.25, %v3947_v50 }
 0x23f   : > { %v669_v55 = vmul.f32 0.25, %v571_v51 }
 0x240   : > { %v674_v0 = vadd.f32 %v670_v54, %v4731_v56 }
 0x241   : > { %v3954_v57 = vpop.f32.mrb[0].mxu0  ;;  %v673_v58 = vadd.f32 %v669_v55, %v4729_v53 }
 0x242   : > { %v660_v59 = vpop.f32.mrb[1].mxu0  ;;  %v672_v61 = vmul.f32 0.25, %v3954_v57  ;;  %v680_v4 = vsel %vm496_vm1, %v674_v0, -inf }
 0x243   : > { %v671_v62 = vmul.f32 0.25, %v660_v59  ;;  %v677_v63 = vsel %vm496_vm1, %v673_v58, -inf }
 0x244   : > { %678 = vmax.xlane.f32.xlu1 %v677_v63  ;;  %v676_v5 = vadd.f32 %v672_v61, %v4738_v1 }
 0x245   : > { %v675_v2 = vadd.f32 %v671_v62, %v4734_v60 }
 0x246   : > { %v686_v10 = vsel %vm496_vm1, %v676_v5, -inf }
 0x247   : > { %v683_v3 = vsel %vm496_vm1, %v675_v2, -inf }
 0x248   : > { %684 = vmax.xlane.f32.xlu0 %v683_v3  ;;  %681 = vmax.xlane.f32.xlu1 %v680_v4 }
 0x24c   : > { %687 = vmax.xlane.f32.xlu1 %v686_v10 }
 0x25d   : > { %4376 = vrot.lane.b32.xlu1 %v4679_v16, %s4577_s26 }
 0x25e   : > { %4381 = vrot.lane.b32.xlu0 %v4689_v20, %s4577_s26 }
 0x261   : > { %4386 = vrot.lane.b32.xlu1 %v4679_v16, %s4578_s29 }
 0x262   : > { %988 = vrot.lane.b32.xlu0 %v4683_v19, %s4579_s30 }
 0x265   : > { %4391 = vrot.lane.b32.xlu1 %v4689_v20, %s4578_s29 }
 0x269   : > { %897 = vrot.lane.b32.xlu1 %v4673_v14, %s4579_s30 }
 0x26d   : > { %899 = vrot.lane.b32.xlu1 %v4671_v12, %s4579_s30 }
 0x2d1   : > { %v679_v11 = vpop.xlane.xlu1 %678 }
 0x2d2   : > { %v689_v13 = vsub.f32 %v673_v58, %v679_v11 }
 0x2d4   : > { %v693_v23 = vmul.f32 1.442695, %v689_v13 }
 0x2d5   : > { %v685_v15 = vpop.xlane.xlu0 %684  ;;  %v682_v18 = vpop.xlane.xlu1 %681 }
 0x2d6   : > { %v690_v21 = vsub.f32 %v674_v0, %v682_v18  ;;  %v691_v27 = vsub.f32 %v675_v2, %v685_v15 }
 0x2d8   : > { %v695_v22 = vmul.f32 1.442695, %v690_v21  ;;  %v697_v33 = vmul.f32 1.442695, %v691_v27 }
 0x2d9   : > { %v688_v25 = vpop.xlane.xlu1 %687  ;;  %v4382_v19 = vpop.permute.xlu0 %4381 }
 0x2da   : > { %v692_v26 = vsub.f32 %v676_v5, %v688_v25  ;;  %4445 = vpow2.f32 %v695_v22  ;;  %v4384_v30 = vunpack.i.h.bf16 %v4382_v19  ;;  %v4383_v14 = vunpack.i.l.bf16 %v4382_v19 }
 0x2db   : > { %4447 = vpow2.f32 %v693_v23 }
 0x2dc   : > { %v699_v28 = vmul.f32 1.442695, %v692_v26  ;;  %v4203_v36 = vpack.c.bf16 %v4384_v30, %v4383_v14 }
 0x2dd   : > { %v4377_v29 = vpop.permute.xlu1 %4376  ;;  %v989_v10 = vpop.permute.xlu0 %988 }
 0x2de   : > { %v4379_v31 = vunpack.i.h.bf16 %v4377_v29  ;;  %v4378_v32 = vunpack.i.l.bf16 %v4377_v29  ;;  %4449 = vpow2.f32 %v699_v28 }
 0x2df   : > { %4451 = vpow2.f32 %v697_v33 }
 0x2e0   : > { %v4199_v12 = vpack.c.bf16 %v4379_v31, %v4378_v32 }
 0x2e1   : > { %v4387_v35 = vpop.permute.xlu1 %4386 }
 0x2e2   : > { %v4389_v37 = vunpack.i.h.bf16 %v4387_v35  ;;  %v4388_v38 = vunpack.i.l.bf16 %v4387_v35  ;;  %4200 = vmatprep.subr.bf16.mxu1 %v4199_v12 }
 0x2e3   : > { %4202 = vmatpush3.bf16.msra.mxu1 %v4199_v12 }
 0x2e4   : > { %v4207_v39 = vpack.c.bf16 %v4389_v37, %v4388_v38  ;;  %4204 = vmatprep.subr.bf16.mxu1 %v4203_v36  ;;  %v4446_v40 = vpop.eup %4445 }
 0x2e5   : > { %v4392_v41 = vpop.permute.xlu1 %4391  ;;  %v704_v42 = vsel %vm496_vm1, %v4446_v40, 0.0  ;;  %v4448_v43 = vpop.eup %4447 }
 0x2e6   : > { %4209 = vmatprep.subr.msk.bf16.mxu0 %vm4697_vm2, %v4207_v39  ;;  %705 = vadd.xlane.f32.xlu1 %v704_v42  ;;  %v701_v46 = vsel %vm496_vm1, %v4448_v43, 0.0  ;;  %v4394_v61 = vunpack.i.h.bf16 %v4392_v41  ;;  %v4393_v62 = vunpack.i.l.bf16 %v4392_v41 }
 0x2e7   : > { %4212 = vmatpush3.bf16.xpose.msk.msra.mxu0 %vm4697_vm2, %v4207_v39 }
 0x2e8   : > { %v4450_v47 = vpop.eup %4449  ;;  %v4213_v2 = vpack.c.bf16 %v4394_v61, %v4393_v62 }
 0x2e9   : > { %v898_v44 = vpop.permute.xlu1 %897  ;;  %v710_v49 = vsel %vm496_vm1, %v4450_v47, 0.0  ;;  %v4452_v50 = vpop.eup %4451 }
 0x2ea   : > { %3973 = vmatprep.mubr.msk.f32.mxu0 %vm496_vm1, %v898_v44  ;;  %702 = vadd.xlane.f32.xlu1 %v701_v46  ;;  %v707_v51 = vsel %vm496_vm1, %v4452_v50, 0.0 }
 0x2ed   : > { %v900_v48 = vpop.permute.xlu1 %899 }
 0x2ee   : > { %3974 = vmatmul.mubr.msk.f32.vlgmr.msra.gmra.mrb[2].mxu0 %vm496_vm1, %v900_v48  ;;  %711 = vadd.xlane.f32.xlu1 %v710_v49 }
 0x2f2   : > { %708 = vadd.xlane.f32.xlu1 %v707_v51 }
 0x303   : > { %990 = vrot.lane.b32.xlu1 %v4681_v17, %s4579_s30 }
 0x373   : > { %v706_v52 = vpop.xlane.xlu1 %705 }
 0x374   : > { %4453 = vrcp.f32 %v706_v52 }
 0x377   : > { %v703_v54 = vpop.xlane.xlu1 %702 }
 0x378   : > { %4455 = vrcp.f32 %v703_v54 }
 0x37b   : > { %v712_v55 = vpop.xlane.xlu1 %711 }
 0x37c   : > { %4457 = vrcp.f32 %v712_v55 }
 0x37e   : > { %v4454_v58 = vpop.eup %4453 }
 0x37f   : > { %v709_v57 = vpop.xlane.xlu1 %708  ;;  %v718_v0 = vmul.f32 %v4454_v58, %v4446_v40 }
 0x380   : > { %4459 = vrcp.f32 %v709_v57 }
 0x382   : > { %v4456_v59 = vpop.eup %4455 }
 0x383   : > { %v717_v63 = vmul.f32 %v4456_v59, %v4448_v43  ;;  %v991_v11 = vpop.permute.xlu1 %990 }
 0x385   : > { %3959 = vmatprep.mubr.msk.f32.mxu1 %vm496_vm1, %v717_v63 }
 0x386   : > { %3960 = vmatmul.mubr.msk.f32.vlgmr.msra.gmra.mrb[6].mxu1 %vm496_vm1, %v718_v0  ;;  %v4458_v17 = vpop.eup %4457 }
 0x387   : > { %4206 = vmatpush3.bf16.msra.mxu1 %v4203_v36  ;;  %v720_v5 = vmul.f32 %v4458_v17, %v4450_v47 }
 0x388   : > { %4215 = vmatprep.subr.msk.bf16.mxu1 %vm4697_vm2, %v4213_v2 }
 0x38a   : > { %v4460_v3 = vpop.eup %4459 }
 0x38b   : > { %v719_v4 = vmul.f32 %v4460_v3, %v4452_v50 }
 0x38d   : > { %3966 = vmatprep.mubr.msk.f32.mxu1 %vm496_vm1, %v719_v4  ;;  %v1305_v4 = vld [vmem:[%s5237_s3 + $0x10] sm:$0xff] }
 0x38e   : > { %3967 = vmatmul.mubr.msk.f32.vlgmr.msra.gmra.mrb[8].mxu1 %vm496_vm1, %v720_v5  ;;  %v1306_v5 = vld [vmem:[%s5237_s3 + $0x18] sm:$0xff] }
 0x38f   : > { %3980 = vmatprep.mubr.msk.f32.mxu1 %vm496_vm1, %v989_v10 }
 0x390   : > { %4218 = vmatpush3.bf16.xpose.msk.msra.mxu1 %vm4697_vm2, %v4213_v2 }
 0x397   : > { %3981 = vmatmul.mubr.msk.f32.vlgmr.msra.gmra.mrb[10].mxu1 %vm496_vm1, %v991_v11 }
 0x3c1   : > { %v3975_v13 = vpop.f32.mrb[2].mxu0 }
 0x3c2   : > { %v1080_v15 = vmul.f32 0.25, %v3975_v13  ;;  %v979_v18 = vpop.f32.mrb[3].mxu0  ;;  %v4227_v13 = vpack.c.bf16 %v1306_v5, %v1305_v4 }
 0x3c3   : > { %v1079_v21 = vmul.f32 0.25, %v979_v18 }
 0x3c4   : > { %v1084_v22 = vadd.f32 %v1080_v15, %v4731_v56 }
 0x3c5   : > { %v1083_v23 = vadd.f32 %v1079_v21, %v4729_v53 }
 0x3c6   : > { %v1090_v25 = vsel %vm496_vm1, %v1084_v22, -inf }
 0x3c7   : > { %1091 = vmax.xlane.f32.xlu1 %v1090_v25  ;;  %v1087_v26 = vsel %vm496_vm1, %v1083_v23, -inf }
 0x3c8   : > { %1088 = vmax.xlane.f32.xlu0 %v1087_v26 }
 0x454   : > { %v1092_v14 = vpop.xlane.xlu1 %1091 }
 0x455   : > { %v1089_v19 = vpop.xlane.xlu0 %1088  ;;  %v1100_v33 = vsub.f32 %v1084_v22, %v1092_v14  ;;  %v896_v14 = vld [vmem:[%s5237_s3 + $0x8] sm:$0xff] }
 0x456   : > { %v1099_v27 = vsub.f32 %v1083_v23, %v1089_v19 }
 0x457   : > { %v1105_v36 = vmul.f32 1.442695, %v1100_v33 }
 0x458   : > { %v1103_v28 = vmul.f32 1.442695, %v1099_v27 }
 0x459   : > { %v4785_v29 = vpop.f32.mrb[6].mxu1 }
 0x45a   : > { %4461 = vpow2.f32 %v1103_v28  ;;  %v4787_v30 = vpop.f32.mrb[7].mxu1  ;;  %v895_v28 = vld [vmem:[%s5237_s3] sm:$0xff] }
 0x45b   : > { %4463 = vpow2.f32 %v1105_v36 }
 0x461   : > { %v4789_v31 = vpop.f32.mrb[8].mxu1 }
 0x462   : > { %v4791_v32 = vpop.f32.mrb[9].mxu1 }
 0x464   : > { %v4462_v12 = vpop.eup %4461 }
 0x465   : > { %v1111_v35 = vsel %vm496_vm1, %v4462_v12, 0.0  ;;  %v4464_v46 = vpop.eup %4463 }
 0x466   : > { %1112 = vadd.xlane.f32.xlu1 %v1111_v35  ;;  %v1114_v47 = vsel %vm496_vm1, %v4464_v46, 0.0 }
 0x46a   : > { %v3982_v37 = vpop.f32.mrb[10].mxu1 }
 0x46b   : > { %v1070_v38 = vpop.f32.mrb[11].mxu1  ;;  %v1082_v39 = vmul.f32 0.25, %v3982_v37 }
 0x46c   : > { %v1081_v40 = vmul.f32 0.25, %v1070_v38  ;;  %v3682_v38 = vld [vmem:[%s5240_s6 + $0x1] ss:$0 sm:$0xff] }
 0x46d   : > { %v1086_v43 = vadd.f32 %v1082_v39, %v4738_v1 }
 0x46e   : > { %v1085_v41 = vadd.f32 %v1081_v40, %v4734_v60 }
 0x46f   : > { %v1096_v44 = vsel %vm496_vm1, %v1086_v43, -inf }
 0x470   : > { %v1093_v42 = vsel %vm496_vm1, %v1085_v41, -inf }
 0x471   : > { %1094 = vmax.xlane.f32.xlu0 %v1093_v42 }
 0x475   : > { %1097 = vmax.xlane.f32.xlu0 %v1096_v44 }
 0x479   : > { %1115 = vadd.xlane.f32.xlu0 %v1114_v47 }
 0x4f3   : > { %v1113_v48 = vpop.xlane.xlu1 %1112 }
 0x4f4   : > { %4465 = vrcp.f32 %v1113_v48 }
 0x4fe   : > { %v4466_v49 = vpop.eup %4465  ;;  %v1095_v50 = vpop.xlane.xlu0 %1094 }
 0x4ff   : > { %v1127_v51 = vmul.f32 %v4466_v49, %v4462_v12  ;;  %v1101_v52 = vsub.f32 %v1085_v41, %v1095_v50  ;;  %v4231_v12 = vpack.c.bf16 %v896_v14, %v895_v28 }
 0x501   : > { %3987 = vmatprep.mubr.msk.f32.mxu0 %vm496_vm1, %v1127_v51  ;;  %v1107_v54 = vmul.f32 1.442695, %v1101_v52 }
 0x502   : > { %v1098_v55 = vpop.xlane.xlu0 %1097 }
 0x503   : > { %4467 = vpow2.f32 %v1107_v54  ;;  %v1102_v57 = vsub.f32 %v1086_v43, %v1098_v55 }
 0x505   : > { %v1109_v58 = vmul.f32 1.442695, %v1102_v57 }
 0x506   : > { %v1116_v0 = vpop.xlane.xlu0 %1115 }
 0x507   : > { %4469 = vpow2.f32 %v1109_v58 }
 0x508   : > { %4471 = vrcp.f32 %v1116_v0 }
 0x50d   : > { %v4468_v59 = vpop.eup %4467 }
 0x50e   : > { %v1117_v61 = vsel %vm496_vm1, %v4468_v59, 0.0 }
 0x50f   : > { %1118 = vadd.xlane.f32.xlu1 %v1117_v61 }
 0x511   : > { %v4470_v62 = vpop.eup %4469 }
 0x512   : > { %v1120_v63 = vsel %vm496_vm1, %v4470_v62, 0.0 }
 0x513   : > { %1121 = vadd.xlane.f32.xlu0 %v1120_v63 }
 0x520   : > { %4396 = vrot.lane.b32.xlu1 %v4679_v16, %s4580_s9 }
 0x529   : > { %4401 = vrot.lane.b32.xlu0 %v4689_v20, %s4580_s9  ;;  %v4472_v20 = vpop.eup %4471 }
 0x52a   : > { %v1128_v23 = vmul.f32 %v4472_v20, %v4464_v46  ;;  %v1587_v20 = vld [vmem:[%s5238_s4 + $0x10] sm:$0xff] }
 0x59c   : > { %v1119_v2 = vpop.xlane.xlu1 %1118 }
 0x59d   : > { %4473 = vrcp.f32 %v1119_v2 }
 0x5a0   : > { %v4397_v17 = vpop.permute.xlu1 %4396  ;;  %v1122_v3 = vpop.xlane.xlu0 %1121 }
 0x5a1   : > { %v4399_v10 = vunpack.i.h.bf16 %v4397_v17  ;;  %v4398_v11 = vunpack.i.l.bf16 %v4397_v17  ;;  %4475 = vrcp.f32 %v1122_v3 }
 0x5a3   : > { %v4219_v16 = vpack.c.bf16 %v4399_v10, %v4398_v11  ;;  %v1585_v11 = vld [vmem:[%s5238_s4] sm:$0xff] }
 0x5a4   : > { %v4402_v15 = vpop.permute.xlu0 %4401 }
 0x5a5   : > { %v4404_v18 = vunpack.i.h.bf16 %v4402_v15  ;;  %v4403_v21 = vunpack.i.l.bf16 %v4402_v15  ;;  %4220 = vmatprep.subr.bf16.mxu0 %v4219_v16  ;;  %v1588_v15 = vld [vmem:[%s5238_s4 + $0x18] sm:$0xff] }
 0x5a6   : > { %4222 = vmatpush3.bf16.msra.mxu0 %v4219_v16  ;;  %v1586_v16 = vld [vmem:[%s5238_s4 + $0x8] sm:$0xff] }
 0x5a7   : > { %v4474_v22 = vpop.eup %4473  ;;  %v4223_v25 = vpack.c.bf16 %v4404_v18, %v4403_v21  ;;  %4228 = vmatprep.subr.bf16.mxu0 %v4227_v13  ;;  %v4239_v18 = vpack.c.bf16 %v1588_v15, %v1587_v20 }
 0x5a8   : > { %v1129_v26 = vmul.f32 %v4474_v22, %v4468_v59 }
 0x5a9   : > { %3988 = vmatmul.mubr.msk.f32.vlgmr.msra.gmra.mrb[4].mxu0 %vm496_vm1, %v1128_v23  ;;  %4224 = vmatprep.subr.bf16.mxu1 %v4223_v25 }
 0x5aa   : > { %4226 = vmatpush3.bf16.msra.mxu1 %v4223_v25  ;;  %3994 = vmatprep.mubr.msk.f32.mxu1 %vm496_vm1, %v1129_v26 }
 0x5ab   : > { %v4476_v19 = vpop.eup %4475  ;;  %4230 = vmatpush3.bf16.msra.mxu0 %v4227_v13  ;;  %v4235_v13 = vpack.c.bf16 %v1586_v16, %v1585_v11 }
 0x5ac   : > { %v1130_v27 = vmul.f32 %v4476_v19, %v4470_v62  ;;  %4232 = vmatprep.subr.bf16.mxu0 %v4231_v12 }
 0x5ad   : > { %4236 = vmatprep.subr.bf16.mxu1 %v4235_v13 }
 0x5ae   : > { %3995 = vmatmul.mubr.msk.f32.vlgmr.msra.gmra.mrb[12].mxu1 %vm496_vm1, %v1130_v27 }
 0x5af   : > { %4238 = vmatpush3.bf16.msra.mxu1 %v4235_v13 }
 0x5b0   : > { %4240 = vmatprep.subr.bf16.mxu1 %v4239_v18 }
 0x5b3   : > { %4242 = vmatpush3.bf16.msra.mxu1 %v4239_v18 }
 0x67c   : > { %v3989_v33 = vpop.f32.mrb[4].mxu0 }
 0x67d   : > { %v1209_v35 = vpop.f32.mrb[5].mxu0 }
 0x67e   : > { %4001 = vmatprep.mubr.msk.f32.mxu0 %vm496_vm1, %v1209_v35 }
 0x67f   : > { %4002 = vmatmul.mubr.msk.f32.vlgmr.msra.gmra.mrb[6].mxu0 %vm496_vm1, %v3989_v33 }
 0x680   : > { %4234 = vmatpush3.bf16.msra.mxu0 %v4231_v12 }
 0x681   : > { %v3996_v36 = vpop.f32.mrb[12].mxu1 }
 0x682   : > { %v1296_v37 = vpop.f32.mrb[13].mxu1 }
 0x683   : > { %4004 = vmatprep.mubr.msk.f32.mxu0 %vm496_vm1, %v1296_v37  ;;  %v3683_v37 = vld [vmem:[%s5240_s6 + $0x4] ss:$0 sm:$0xff] }
 0x684   : > { %4005 = vmatmul.mubr.msk.f32.gmra.mrb[8].mxu0 %vm496_vm1, %v3996_v36 }
 0x685   : > { %4011 = vmatprep.mubr.msk.f32.mxu0 %vm496_vm1, %v4787_v30 }
 0x688   : > { %4012 = vmatmul.mubr.msk.f32.vlgmr.msra.gmra.mrb[6].mxu0 %vm496_vm1, %v4785_v29 }
 0x689   : > { %4014 = vmatprep.mubr.msk.f32.mxu0 %vm496_vm1, %v4791_v32 }
 0x68c   : > { %4015 = vmatmul.mubr.msk.f32.gmra.mrb[8].mxu0 %vm496_vm1, %v4789_v31 }
 0x75b   : > { %v4013_v39 = vpop.f32.mrb[6].mxu0 }
 0x75c   : > { %v1507_v40 = vadd.f32 %v4013_v39, %v3682_v38  ;;  %v1482_v41 = vpop.f32.mrb[7].mxu0 }
 0x75d   : > { %v1506_v42 = vadd.f32 %v3682_v38, %v1482_v41  ;;  %v3684_v41 = vld [vmem:[%s5240_s6 + $0x5] ss:$0 sm:$0xff] }
 0x75e   : > { %v1511_v43 = vadd.f32 %v1507_v40, %v4656_v7 }
 0x75f   : > { %v4016_v30 = vpop.f32.mrb[8].mxu0  ;;  %v1510_v44 = vadd.f32 %v1506_v42, %v4652_v6 }
 0x760   : > { %v1509_v29 = vadd.f32 %v4016_v30, %v3682_v38  ;;  %v1492_v46 = vpop.f32.mrb[9].mxu0  ;;  %v1519_v32 = vsel %vm392_vm0, %v1511_v43, 0.0 }
 0x761   : > { %v1508_v47 = vadd.f32 %v3682_v38, %v1492_v46  ;;  %1520 = vadd.xlane.f32.xlu0 %v1519_v32  ;;  %v1516_v31 = vsel %vm392_vm0, %v1510_v44, 0.0 }
 0x762   : > { %1517 = vadd.xlane.f32.xlu1 %v1516_v31  ;;  %v1513_v48 = vadd.f32 %v1509_v29, %v4664_v9 }
 0x763   : > { %v1512_v49 = vadd.f32 %v1508_v47, %v4658_v8 }
 0x764   : > { %v1525_v50 = vsel %vm392_vm0, %v1513_v48, 0.0 }
 0x765   : > { %1526 = vadd.xlane.f32.xlu0 %v1525_v50  ;;  %v1522_v7 = vsel %vm392_vm0, %v1512_v49, 0.0 }
 0x766   : > { %1523 = vadd.xlane.f32.xlu1 %v1522_v7  ;;  %v1727_v7 = vld [vmem:[%s5239_s5] sm:$0xff] }
 0x7ee   : > { %v1521_v6 = vpop.xlane.xlu0 %1520 }
 0x7ef   : > { %v1530_v51 = vmul.f32 0.03125, %v1521_v6  ;;  %v1518_v52 = vpop.xlane.xlu1 %1517  ;;  %v1728_v6 = vld [vmem:[%s5239_s5 + $0x8] sm:$0xff] }
 0x7f0   : > { %v1529_v54 = vmul.f32 0.03125, %v1518_v52  ;;  %v1729_v52 = vld [vmem:[%s5239_s5 + $0x10] sm:$0xff] }
 0x7f1   : > { %v1534_v55 = vsub.f32 %v1511_v43, %v1530_v51  ;;  %v4243_v51 = vpack.c.bf16 %v1728_v6, %v1727_v7 }
 0x7f2   : > { %v1533_v57 = vsub.f32 %v1510_v44, %v1529_v54  ;;  %v1527_v58 = vpop.xlane.xlu0 %1526  ;;  %v1730_v54 = vld [vmem:[%s5239_s5 + $0x18] sm:$0xff] }
 0x7f3   : > { %v1532_v59 = vmul.f32 0.03125, %v1527_v58  ;;  %v1524_v61 = vpop.xlane.xlu1 %1523  ;;  %v1538_v62 = vmul.f32 %v1534_v55, %v1534_v55  ;;  %4244 = vmatprep.subr.bf16.mxu1 %v4243_v51  ;;  %v1732_v58 = vld [vmem:[%s5239_s5 + $0x28] sm:$0xff] }
 0x7f4   : > { %v1531_v63 = vmul.f32 0.03125, %v1524_v61  ;;  %v1537_v9 = vmul.f32 %v1533_v57, %v1533_v57  ;;  %v1733_v61 = vld [vmem:[%s5239_s5 + $0x30] sm:$0xff] }
 0x7f5   : > { %v1536_v0 = vsub.f32 %v1513_v48, %v1532_v59  ;;  %v1544_v8 = vsel %vm392_vm0, %v1538_v62, 0.0  ;;  %v1734_v62 = vld [vmem:[%s5239_s5 + $0x38] sm:$0xff] }
 0x7f6   : > { %v1535_v2 = vsub.f32 %v1512_v49, %v1531_v63  ;;  %1545 = vadd.xlane.f32.xlu0 %v1544_v8  ;;  %v1541_v17 = vsel %vm392_vm0, %v1537_v9, 0.0  ;;  %v4255_v63 = vpack.c.bf16 %v1734_v62, %v1733_v61  ;;  %v3685_v9 = vld [vmem:[%s5240_s6 + $0x2] ss:$0 sm:$0xff] }
 0x7f7   : > { %1542 = vadd.xlane.f32.xlu1 %v1541_v17  ;;  %v1540_v3 = vmul.f32 %v1536_v0, %v1536_v0 }
 0x7f8   : > { %v1539_v4 = vmul.f32 %v1535_v2, %v1535_v2 }
 0x7f9   : > { %v1550_v5 = vsel %vm392_vm0, %v1540_v3, 0.0 }
 0x7fa   : > { %1551 = vadd.xlane.f32.xlu0 %v1550_v5  ;;  %v1547_v10 = vsel %vm392_vm0, %v1539_v4, 0.0 }
 0x7fb   : > { %1548 = vadd.xlane.f32.xlu1 %v1547_v10 }
 0x883   : > { %v1546_v21 = vpop.xlane.xlu0 %1545 }
 0x884   : > { %v1554_v22 = vmul.f32 0.03125, %v1546_v21  ;;  %v1543_v23 = vpop.xlane.xlu1 %1542 }
 0x885   : > { %v1553_v25 = vmul.f32 0.03125, %v1543_v23 }
 0x886   : > { %v1558_v26 = vadd.f32 1e-05, %v1554_v22 }
 0x887   : > { %v1557_v19 = vadd.f32 1e-05, %v1553_v25  ;;  %v1552_v27 = vpop.xlane.xlu0 %1551 }
 0x888   : > { %4477 = vrsqrt.f32 %v1558_v26  ;;  %v1556_v28 = vmul.f32 0.03125, %v1552_v27  ;;  %v1549_v14 = vpop.xlane.xlu1 %1548 }
 0x889   : > { %4479 = vrsqrt.f32 %v1557_v19  ;;  %v1555_v12 = vmul.f32 0.03125, %v1549_v14 }
 0x88a   : > { %v1560_v33 = vadd.f32 1e-05, %v1556_v28 }
 0x88b   : > { %v1559_v35 = vadd.f32 1e-05, %v1555_v12 }
 0x88c   : > { %4481 = vrsqrt.f32 %v1560_v33 }
 0x88d   : > { %4483 = vrsqrt.f32 %v1559_v35 }
 0x892   : > { %v4478_v36 = vpop.eup %4477 }
 0x893   : > { %v4480_v38 = vpop.eup %4479  ;;  %v1566_v39 = vmul.f32 %v4478_v36, %v1534_v55  ;;  %v4247_v55 = vpack.c.bf16 %v1730_v54, %v1729_v52  ;;  %v3690_v54 = vld [vmem:[%s5240_s6 + $0x3] ss:$0 sm:$0xff] }
 0x894   : > { %v1565_v40 = vmul.f32 %v4480_v38, %v1533_v57  ;;  %v1731_v57 = vld [vmem:[%s5239_s5 + $0x20] sm:$0xff] }
 0x895   : > { %v1574_v42 = vmul.f32 %v3683_v37, %v1566_v39  ;;  %v4251_v59 = vpack.c.bf16 %v1732_v58, %v1731_v57 }
 0x896   : > { %v4482_v43 = vpop.eup %4481  ;;  %v1573_v30 = vmul.f32 %v3683_v37, %v1565_v40 }
 0x897   : > { %v4484_v44 = vpop.eup %4483  ;;  %v1568_v29 = vmul.f32 %v4482_v43, %v1536_v0  ;;  %v4868_v47 = vadd.f32 %v3684_v41, %v1574_v42 }
 0x898   : > { %v4866_v46 = vadd.f32 %v3684_v41, %v1573_v30  ;;  %v1567_v32 = vmul.f32 %v4484_v44, %v1535_v2 }
 0x899   : > { %v1576_v31 = vmul.f32 %v3683_v37, %v1568_v29 }
 0x89a   : > { %4025 = vmatprep.mubr.msk.f32.mxu1 %vm392_vm0, %v4866_v46  ;;  %v1575_v48 = vmul.f32 %v3683_v37, %v1567_v32 }
 0x89b   : > { %4026 = vmatmul.mubr.msk.f32.vlgmr.msra.gmra.mrb[14].mxu1 %vm392_vm0, %v4868_v47  ;;  %v4876_v50 = vadd.f32 %v3684_v41, %v1576_v31 }
 0x89c   : > { %v4874_v49 = vadd.f32 %v3684_v41, %v1575_v48  ;;  %4246 = vmatpush3.bf16.msra.mxu1 %v4243_v51 }
 0x89d   : > { %4248 = vmatprep.subr.bf16.mxu1 %v4247_v55 }
 0x89e   : > { %4028 = vmatprep.mubr.msk.f32.mxu1 %vm392_vm0, %v4874_v49 }
 0x89f   : > { %4029 = vmatmul.mubr.msk.f32.gmra.mrb[16].mxu1 %vm392_vm0, %v4876_v50 }
 0x8a0   : > { %4250 = vmatpush3.bf16.msra.mxu1 %v4247_v55 }
 0x8a1   : > { %4252 = vmatprep.subr.bf16.mxu1 %v4251_v59 }
 0x8a4   : > { %4254 = vmatpush3.bf16.msra.mxu1 %v4251_v59 }
 0x8a5   : > { %4256 = vmatprep.subr.bf16.mxu1 %v4255_v63 }
 0x8a8   : > { %4258 = vmatpush3.bf16.msra.mxu1 %v4255_v63 }
 0x96e   : > { %v4027_v0 = vpop.f32.mrb[14].mxu1 }
 0x96f   : > { %v1678_v8 = vadd.f32 %v4027_v0, %v3685_v9  ;;  %v1672_v2 = vpop.f32.mrb[15].mxu1 }
 0x970   : > { %v1673_v17 = vadd.f32 %v3685_v9, %v1672_v2 }
 0x971   : > { %v1692_v3 = vmul.f32 %v1678_v8, %v1678_v8 }
 0x972   : > { %v1691_v4 = vmul.f32 %v1673_v17, %v1673_v17  ;;  %v4030_v5 = vpop.f32.mrb[16].mxu1 }
 0x973   : > { %v1696_v10 = vmul.f32 %v1692_v3, %v1678_v8  ;;  %v1688_v11 = vadd.f32 %v4030_v5, %v3685_v9  ;;  %v1682_v16 = vpop.f32.mrb[17].mxu1 }
 0x974   : > { %v1695_v13 = vmul.f32 %v1691_v4, %v1673_v17  ;;  %v1683_v20 = vadd.f32 %v3685_v9, %v1682_v16 }
 0x975   : > { %v1700_v15 = vmul.f32 0.044715, %v1696_v10  ;;  %v1694_v18 = vmul.f32 %v1688_v11, %v1688_v11 }
 0x976   : > { %v1699_v21 = vmul.f32 0.044715, %v1695_v13  ;;  %v1693_v22 = vmul.f32 %v1683_v20, %v1683_v20 }
 0x977   : > { %v1704_v23 = vadd.f32 %v1700_v15, %v1678_v8  ;;  %v1698_v25 = vmul.f32 %v1694_v18, %v1688_v11 }
 0x978   : > { %v1703_v26 = vadd.f32 %v1699_v21, %v1673_v17  ;;  %v1697_v19 = vmul.f32 %v1693_v22, %v1683_v20 }
 0x979   : > { %v1708_v27 = vmul.f32 0.7978846, %v1704_v23  ;;  %v1702_v28 = vmul.f32 0.044715, %v1698_v25 }
 0x97a   : > { %v1707_v14 = vmul.f32 0.7978846, %v1703_v26  ;;  %v1701_v12 = vmul.f32 0.044715, %v1697_v19 }
 0x97b   : > { %4485 = vtanh.f32 %v1708_v27  ;;  %v1706_v33 = vadd.f32 %v1702_v28, %v1688_v11 }
 0x97c   : > { %4487 = vtanh.f32 %v1707_v14  ;;  %v1705_v35 = vadd.f32 %v1701_v12, %v1683_v20 }
 0x97d   : > { %v1710_v36 = vmul.f32 0.7978846, %v1706_v33  ;;  %v3697_v33 = vld [vmem:[%s5236_s2 + $0x20] sm:$0xff] }
 0x97e   : > { %v1709_v37 = vmul.f32 0.7978846, %v1705_v35  ;;  %v3698_v35 = vld [vmem:[%s5236_s2 + $0x28] sm:$0xff] }
 0x97f   : > { %4489 = vtanh.f32 %v1710_v36  ;;  %v4259_v36 = vpack.c.bf16 %v3698_v35, %v3697_v33 }
 0x980   : > { %4491 = vtanh.f32 %v1709_v37  ;;  %v3699_v37 = vld [vmem:[%s5236_s2 + $0x30] sm:$0xff] }
 0x981   : > { %4260 = vmatprep.subr.bf16.mxu0 %v4259_v36 }
 0x982   : > { %4262 = vmatpush3.bf16.msra.mxu0 %v4259_v36 }
 0x985   : > { %v4486_v38 = vpop.eup %4485 }
 0x986   : > { %v4488_v39 = vpop.eup %4487  ;;  %v1716_v40 = vadd.f32 1.0, %v4486_v38  ;;  %v3700_v38 = vld [vmem:[%s5236_s2 + $0x38] sm:$0xff] }
 0x987   : > { %v1715_v41 = vadd.f32 1.0, %v4488_v39  ;;  %v4263_v39 = vpack.c.bf16 %v3700_v38, %v3699_v37 }
 0x988   : > { %v1720_v42 = vmul.f32 0.5, %v1716_v40 }
 0x989   : > { %v4490_v43 = vpop.eup %4489  ;;  %v1719_v30 = vmul.f32 0.5, %v1715_v41  ;;  %4264 = vmatprep.subr.bf16.mxu0 %v4263_v39 }
 0x98a   : > { %v4492_v44 = vpop.eup %4491  ;;  %v1718_v29 = vadd.f32 1.0, %v4490_v43  ;;  %v1724_v48 = vmul.f32 %v1720_v42, %v1678_v8  ;;  %4266 = vmatpush3.bf16.msra.mxu0 %v4263_v39 }
 0x98b   : > { %v1723_v32 = vmul.f32 %v1719_v30, %v1673_v17  ;;  %v1717_v31 = vadd.f32 1.0, %v4492_v44 }
 0x98c   : > { %v1722_v7 = vmul.f32 0.5, %v1718_v29 }
 0x98d   : > { %4047 = vmatprep.mubr.msk.f32.mxu1 %vm1740_vm14, %v1723_v32  ;;  %v1721_v6 = vmul.f32 0.5, %v1717_v31 }
 0x98e   : > { %4048 = vmatmul.mubr.msk.f32.vlgmr.msra.gmra.mrb[18].mxu1 %vm1740_vm14, %v1724_v48  ;;  %v1726_v52 = vmul.f32 %v1722_v7, %v1688_v11 }
 0x98f   : > { %v1725_v51 = vmul.f32 %v1721_v6, %v1683_v20 }
 0x991   : > { %4050 = vmatprep.mubr.msk.f32.mxu1 %vm1740_vm14, %v1725_v51 }
 0x992   : > { %4051 = vmatmul.mubr.msk.f32.gmra.mrb[20].mxu1 %vm1740_vm14, %v1726_v52  ;;  %v3695_v52 = vld [vmem:[%s5240_s6 + $0x6] ss:$0 sm:$0xff] }
 0xa61   : > { %v4049_v55 = vpop.f32.mrb[18].mxu1 }
 0xa62   : > { %v1825_v57 = vadd.f32 %v4049_v55, %v3690_v54  ;;  %v1819_v58 = vpop.f32.mrb[19].mxu1 }
 0xa63   : > { %v1820_v59 = vadd.f32 %v3690_v54, %v1819_v58  ;;  %v3696_v58 = vld [vmem:[%s5240_s6 + $0x7] ss:$0 sm:$0xff] }
 0xa64   : > { %v1839_v61 = vadd.f32 %v1825_v57, %v4868_v47 }
 0xa65   : > { %v4052_v62 = vpop.f32.mrb[20].mxu1  ;;  %v1838_v63 = vadd.f32 %v1820_v59, %v4866_v46 }
 0xa66   : > { %v1835_v9 = vadd.f32 %v4052_v62, %v3690_v54  ;;  %v1829_v0 = vpop.f32.mrb[21].mxu1  ;;  %v1847_v8 = vsel %vm392_vm0, %v1839_v61, 0.0 }
 0xa67   : > { %v1830_v2 = vadd.f32 %v3690_v54, %v1829_v0  ;;  %1848 = vadd.xlane.f32.xlu0 %v1847_v8  ;;  %v1844_v17 = vsel %vm392_vm0, %v1838_v63, 0.0 }
 0xa68   : > { %1845 = vadd.xlane.f32.xlu1 %v1844_v17  ;;  %v1841_v3 = vadd.f32 %v1835_v9, %v4876_v50 }
 0xa69   : > { %v1840_v4 = vadd.f32 %v1830_v2, %v4874_v49 }
 0xa6a   : > { %v1853_v5 = vsel %vm392_vm0, %v1841_v3, 0.0 }
 0xa6b   : > { %1854 = vadd.xlane.f32.xlu0 %v1853_v5  ;;  %v1850_v47 = vsel %vm392_vm0, %v1840_v4, 0.0 }
 0xa6c   : > { %1851 = vadd.xlane.f32.xlu1 %v1850_v47  ;;  %v3702_v47 = vld [vmem:[%s5240_s6 + $0x8] ss:$0 sm:$0xff] }
 0xaf4   : > { %v1849_v46 = vpop.xlane.xlu0 %1848 }
 0xaf5   : > { %v1857_v10 = vmul.f32 0.03125, %v1849_v46  ;;  %v1846_v11 = vpop.xlane.xlu1 %1845 }
 0xaf6   : > { %v1856_v16 = vmul.f32 0.03125, %v1846_v11 }
 0xaf7   : > { %v1861_v13 = vsub.f32 %v1839_v61, %v1857_v10 }
 0xaf8   : > { %v1860_v20 = vsub.f32 %v1838_v63, %v1856_v16  ;;  %v1855_v15 = vpop.xlane.xlu0 %1854 }
 0xaf9   : > { %v1859_v18 = vmul.f32 0.03125, %v1855_v15  ;;  %v1852_v21 = vpop.xlane.xlu1 %1851  ;;  %v1865_v22 = vmul.f32 %v1861_v13, %v1861_v13 }
 0xafa   : > { %v1858_v23 = vmul.f32 0.03125, %v1852_v21  ;;  %v1864_v50 = vmul.f32 %v1860_v20, %v1860_v20 }
 0xafb   : > { %v1863_v25 = vsub.f32 %v1841_v3, %v1859_v18  ;;  %v1871_v49 = vsel %vm392_vm0, %v1865_v22, 0.0 }
 0xafc   : > { %v1862_v26 = vsub.f32 %v1840_v4, %v1858_v23  ;;  %1872 = vadd.xlane.f32.xlu0 %v1871_v49  ;;  %v1868_v19 = vsel %vm392_vm0, %v1864_v50, 0.0 }
 0xafd   : > { %1869 = vadd.xlane.f32.xlu1 %v1868_v19  ;;  %v1867_v27 = vmul.f32 %v1863_v25, %v1863_v25 }
 0xafe   : > { %v1866_v28 = vmul.f32 %v1862_v26, %v1862_v26 }
 0xaff   : > { %v1877_v14 = vsel %vm392_vm0, %v1867_v27, 0.0 }
 0xb00   : > { %1878 = vadd.xlane.f32.xlu0 %v1877_v14  ;;  %v1874_v12 = vsel %vm392_vm0, %v1866_v28, 0.0 }
 0xb01   : > { %1875 = vadd.xlane.f32.xlu1 %v1874_v12 }
 0xb89   : > { %v1873_v40 = vpop.xlane.xlu0 %1872 }
 0xb8a   : > { %v1881_v41 = vmul.f32 0.03125, %v1873_v40  ;;  %v1870_v42 = vpop.xlane.xlu1 %1869 }
 0xb8b   : > { %v1880_v43 = vmul.f32 0.03125, %v1870_v42 }
 0xb8c   : > { %v1885_v30 = vadd.f32 1e-05, %v1881_v41 }
 0xb8d   : > { %v1884_v44 = vadd.f32 1e-05, %v1880_v43  ;;  %v1879_v29 = vpop.xlane.xlu0 %1878 }
 0xb8e   : > { %4493 = vrsqrt.f32 %v1885_v30  ;;  %v1883_v32 = vmul.f32 0.03125, %v1879_v29  ;;  %v1876_v31 = vpop.xlane.xlu1 %1875 }
 0xb8f   : > { %4495 = vrsqrt.f32 %v1884_v44  ;;  %v1882_v48 = vmul.f32 0.03125, %v1876_v31 }
 0xb90   : > { %v1887_v7 = vadd.f32 1e-05, %v1883_v32 }
 0xb91   : > { %v1886_v6 = vadd.f32 1e-05, %v1882_v48 }
 0xb92   : > { %4497 = vrsqrt.f32 %v1887_v7 }
 0xb93   : > { %4499 = vrsqrt.f32 %v1886_v6 }
 0xb98   : > { %v4494_v51 = vpop.eup %4493 }
 0xb99   : > { %v4496_v54 = vpop.eup %4495  ;;  %v1893_v55 = vmul.f32 %v4494_v51, %v1861_v13 }
 0xb9a   : > { %v1892_v57 = vmul.f32 %v4496_v54, %v1860_v20 }
 0xb9b   : > { %v1901_v59 = vmul.f32 %v3695_v52, %v1893_v55 }
 0xb9c   : > { %v4498_v61 = vpop.eup %4497  ;;  %v1900_v62 = vmul.f32 %v3695_v52, %v1892_v57 }
 0xb9d   : > { %v4500_v63 = vpop.eup %4499  ;;  %v1895_v9 = vmul.f32 %v4498_v61, %v1863_v25  ;;  %v4948_v2 = vadd.f32 %v3696_v58, %v1901_v59 }
 0xb9e   : > { %v4946_v0 = vadd.f32 %v3696_v58, %v1900_v62  ;;  %v1894_v8 = vmul.f32 %v4500_v63, %v1862_v26 }
 0xb9f   : > { %v1903_v17 = vmul.f32 %v3695_v52, %v1895_v9 }
 0xba0   : > { %4061 = vmatprep.mubr.msk.f32.mxu0 %vm392_vm0, %v4946_v0  ;;  %v1902_v3 = vmul.f32 %v3695_v52, %v1894_v8 }
 0xba1   : > { %4062 = vmatmul.mubr.msk.f32.vlgmr.msra.gmra.mrb[10].mxu0 %vm392_vm0, %v4948_v2  ;;  %v4956_v5 = vadd.f32 %v3696_v58, %v1903_v17 }
 0xba2   : > { %v4954_v4 = vadd.f32 %v3696_v58, %v1902_v3 }
 0xba4   : > { %4064 = vmatprep.mubr.msk.f32.mxu0 %vm392_vm0, %v4954_v4 }
 0xba5   : > { %4065 = vmatmul.mubr.msk.f32.gmra.mrb[12].mxu0 %vm392_vm0, %v4956_v5 }
 0xc74   : > { %v4063_v46 = vpop.f32.mrb[10].mxu0 }
 0xc75   : > { %v4965_v10 = vadd.f32 %v4063_v46, %v3702_v47  ;;  %v2001_v11 = vpop.f32.mrb[11].mxu0 }
 0xc76   : > { %v4967_v16 = vadd.f32 %v3702_v47, %v2001_v11 }
 0xc78   : > { %v4066_v13 = vpop.f32.mrb[12].mxu0  ;;  %4071 = vmatprep.mubr.msk.f32.mxu0 %vm496_vm1, %v4967_v16  ;;  %v4973_v20 = vpack.i.bf16 %v4965_v10, %v4967_v16 }
 0xc79   : > { %v4975_v15 = vadd.f32 %v4066_v13, %v3702_v47  ;;  %v2011_v18 = vpop.f32.mrb[13].mxu0 }
 0xc7a   : > { %v4977_v21 = vadd.f32 %v3702_v47, %v2011_v18  ;;  %4406 = vrot.lane.b32.xlu1 %v4973_v20, %s4573_s21 }
 0xc7c   : > { %4078 = vmatprep.mubr.msk.f32.mxu1 %vm496_vm1, %v4977_v21  ;;  %v4985_v22 = vpack.i.bf16 %v4975_v15, %v4977_v21 }
 0xc7e   : > { %4411 = vrot.lane.b32.xlu0 %v4985_v22, %s4573_s21  ;;  %s320_s21 = scalar_lea.vmem %s5242_s8, %s3643_s22 }
 0xcec   : > { %v4407_v23 = vpop.permute.xlu1 %4406 }
 0xced   : > { %v4409_v50 = vunpack.i.h.bf16 %v4407_v23  ;;  %v4408_v25 = vunpack.i.l.bf16 %v4407_v23 }
 0xcef   : > { %v4267_v49 = vpack.c.bf16 %v4409_v50, %v4408_v25 }
 0xcf0   : > { %v4412_v26 = vpop.permute.xlu0 %4411 }
 0xcf1   : > { %v4414_v19 = vunpack.i.h.bf16 %v4412_v26  ;;  %v4413_v27 = vunpack.i.l.bf16 %v4412_v26  ;;  %4269 = vmatprep.subr.msk.bf16.mxu0 %vm4697_vm2, %v4267_v49 }
 0xcf2   : > { %4272 = vmatpush3.bf16.xpose.msk.msra.mxu0 %vm4697_vm2, %v4267_v49 }
 0xcf3   : > { %v4273_v28 = vpack.c.bf16 %v4414_v19, %v4413_v27 }
 0xcf5   : > { %4275 = vmatprep.subr.msk.bf16.mxu1 %vm4697_vm2, %v4273_v28 }
 0xcf6   : > { %4278 = vmatpush3.bf16.xpose.msk.msra.mxu1 %vm4697_vm2, %v4273_v28 }
 0xcf9   : > { %4072 = vmatmul.mubr.msk.f32.vlgmr.msra.gmra.mrb[14].mxu0 %vm496_vm1, %v4965_v10 }
 0xcfd   : > { %4079 = vmatmul.mubr.msk.f32.vlgmr.msra.gmra.mrb[22].mxu1 %vm496_vm1, %v4975_v15 }
 0xdcc   : > { %v4073_v14 = vpop.f32.mrb[14].mxu0 }
 0xdcd   : > { %v2199_v12 = vmul.f32 0.25, %v4073_v14  ;;  %v2100_v33 = vpop.f32.mrb[15].mxu0 }
 0xdce   : > { %v2198_v35 = vmul.f32 0.25, %v2100_v33 }
 0xdcf   : > { %v2203_v36 = vadd.f32 %v2199_v12, %v4731_v56 }
 0xdd0   : > { %v4080_v37 = vpop.f32.mrb[22].mxu1  ;;  %v2202_v38 = vadd.f32 %v2198_v35, %v4729_v53 }
 0xdd1   : > { %v2201_v39 = vmul.f32 0.25, %v4080_v37  ;;  %v2189_v40 = vpop.f32.mrb[23].mxu1  ;;  %v2209_v41 = vsel %vm496_vm1, %v2203_v36, -inf }
 0xdd2   : > { %2210 = vmax.xlane.f32.xlu0 %v2209_v41  ;;  %v2206_v42 = vsel %vm496_vm1, %v2202_v38, -inf  ;;  %v2200_v44 = vmul.f32 0.25, %v2189_v40 }
 0xdd3   : > { %2207 = vmax.xlane.f32.xlu1 %v2206_v42  ;;  %v2205_v43 = vadd.f32 %v2201_v39, %v4738_v1 }
 0xdd4   : > { %v2204_v29 = vadd.f32 %v2200_v44, %v4734_v60 }
 0xdd5   : > { %v2215_v30 = vsel %vm496_vm1, %v2205_v43, -inf }
 0xdd6   : > { %2216 = vmax.xlane.f32.xlu0 %v2215_v30  ;;  %v2212_v32 = vsel %vm496_vm1, %v2204_v29, -inf }
 0xde4   : > { %4416 = vrot.lane.b32.xlu1 %v4973_v20, %s4577_s26 }
 0xe08   : > { %2213 = vmax.xlane.f32.xlu1 %v2212_v32 }
 0xe19   : > { %4426 = vrot.lane.b32.xlu1 %v4973_v20, %s4578_s29 }
 0xe1d   : > { %4431 = vrot.lane.b32.xlu1 %v4985_v22, %s4578_s29 }
 0xe5f   : > { %v2211_v31 = vpop.xlane.xlu0 %2210 }
 0xe60   : > { %v2219_v48 = vsub.f32 %v2203_v36, %v2211_v31  ;;  %v2208_v7 = vpop.xlane.xlu1 %2207 }
 0xe61   : > { %v2218_v6 = vsub.f32 %v2202_v38, %v2208_v7 }
 0xe62   : > { %v2224_v51 = vmul.f32 1.442695, %v2219_v48 }
 0xe63   : > { %v2222_v52 = vmul.f32 1.442695, %v2218_v6  ;;  %v2217_v9 = vpop.xlane.xlu0 %2216 }
 0xe64   : > { %4501 = vpow2.f32 %v2224_v51  ;;  %v4417_v54 = vpop.permute.xlu1 %4416  ;;  %v2221_v8 = vsub.f32 %v2205_v43, %v2217_v9 }
 0xe65   : > { %4503 = vpow2.f32 %v2222_v52  ;;  %v4419_v55 = vunpack.i.h.bf16 %v4417_v54  ;;  %v4418_v57 = vunpack.i.l.bf16 %v4417_v54 }
 0xe66   : > { %v2228_v17 = vmul.f32 1.442695, %v2221_v8 }
 0xe67   : > { %v4279_v58 = vpack.c.bf16 %v4419_v55, %v4418_v57 }
 0xe68   : > { %4505 = vpow2.f32 %v2228_v17 }
 0xe69   : > { %4280 = vmatprep.subr.bf16.mxu0 %v4279_v58 }
 0xe6a   : > { %4282 = vmatpush3.bf16.msra.mxu0 %v4279_v58 }
 0xe6e   : > { %v4502_v59 = vpop.eup %4501 }
 0xe6f   : > { %v4504_v61 = vpop.eup %4503  ;;  %v2233_v62 = vsel %vm496_vm1, %v4502_v59, 0.0 }
 0xe70   : > { %2234 = vadd.xlane.f32.xlu0 %v2233_v62  ;;  %v2230_v63 = vsel %vm496_vm1, %v4504_v61, 0.0 }
 0xe71   : > { %2231 = vadd.xlane.f32.xlu1 %v2230_v63 }
 0xe82   : > { %2429 = vrot.lane.b32.xlu1 %v4965_v10, %s4579_s30  ;;  %v4506_v10 = vpop.eup %4505 }
 0xe83   : > { %v2239_v25 = vsel %vm496_vm1, %v4506_v10, 0.0 }
 0xe86   : > { %4421 = vrot.lane.b32.xlu0 %v4985_v22, %s4577_s26 }
 0xe95   : > { %v2214_v3 = vpop.xlane.xlu1 %2213 }
 0xe96   : > { %v2220_v47 = vsub.f32 %v2204_v29, %v2214_v3 }
 0xe98   : > { %v2226_v46 = vmul.f32 1.442695, %v2220_v47 }
 0xe99   : > { %v4427_v11 = vpop.permute.xlu1 %4426 }
 0xe9a   : > { %4507 = vpow2.f32 %v2226_v46  ;;  %v4429_v13 = vunpack.i.h.bf16 %v4427_v11  ;;  %v4428_v18 = vunpack.i.l.bf16 %v4427_v11 }
 0xe9c   : > { %v4287_v23 = vpack.c.bf16 %v4429_v13, %v4428_v18 }
 0xe9d   : > { %v4432_v26 = vpop.permute.xlu1 %4431 }
 0xe9e   : > { %4289 = vmatprep.subr.msk.bf16.mxu1 %vm4697_vm2, %v4287_v23  ;;  %v4434_v37 = vunpack.i.h.bf16 %v4432_v26 }
 0xe9f   : > { %4292 = vmatpush3.bf16.xpose.msk.msra.mxu1 %vm4697_vm2, %v4287_v23 }
 0xea4   : > { %v4508_v50 = vpop.eup %4507 }
 0xea5   : > { %2240 = vadd.xlane.f32.xlu0 %v2239_v25  ;;  %v2236_v49 = vsel %vm496_vm1, %v4508_v50, 0.0 }
 0xea6   : > { %2237 = vadd.xlane.f32.xlu1 %v2236_v49 }
 0xeb7   : > { %2520 = vrot.lane.b32.xlu1 %v4975_v15, %s4579_s30  ;;  %v4433_v15 = vunpack.i.l.bf16 %v4432_v26 }
 0xebb   : > { %2427 = vrot.lane.b32.xlu0 %v4967_v16, %s4579_s30  ;;  %v4293_v16 = vpack.c.bf16 %v4434_v37, %v4433_v15 }
 0xebf   : > { %2518 = vrot.lane.b32.xlu0 %v4977_v21, %s4579_s30 }
 0xefd   : > { %v2235_v19 = vpop.xlane.xlu0 %2234 }
 0xefe   : > { %4509 = vrcp.f32 %v2235_v19  ;;  %v2232_v27 = vpop.xlane.xlu1 %2231 }
 0xeff   : > { %4511 = vrcp.f32 %v2232_v27 }
 0xf01   : > { %v4422_v28 = vpop.permute.xlu0 %4421 }
 0xf02   : > { %v4424_v14 = vunpack.i.h.bf16 %v4422_v28  ;;  %v4423_v12 = vunpack.i.l.bf16 %v4422_v28  ;;  %v2430_v21 = vpop.permute.xlu1 %2429 }
 0xf04   : > { %v4283_v33 = vpack.c.bf16 %v4424_v14, %v4423_v12 }
 0xf06   : > { %4284 = vmatprep.subr.bf16.mxu0 %v4283_v33 }
 0xf08   : > { %v4510_v35 = vpop.eup %4509 }
 0xf09   : > { %v4512_v36 = vpop.eup %4511  ;;  %v2247_v39 = vmul.f32 %v4510_v35, %v4502_v59 }
 0xf0a   : > { %v2246_v38 = vmul.f32 %v4512_v36, %v4504_v61 }
 0xf0c   : > { %4085 = vmatprep.mubr.msk.f32.mxu0 %vm496_vm1, %v2246_v38 }
 0xf0d   : > { %4086 = vmatmul.mubr.msk.f32.vlgmr.msra.gmra.mrb[16].mxu0 %vm496_vm1, %v2247_v39 }
 0xf0e   : > { %4286 = vmatpush3.bf16.msra.mxu0 %v4283_v33 }
 0xf0f   : > { %4295 = vmatprep.subr.msk.bf16.mxu0 %vm4697_vm2, %v4293_v16 }
 0xf32   : > { %v2241_v40 = vpop.xlane.xlu0 %2240 }
 0xf33   : > { %4513 = vrcp.f32 %v2241_v40  ;;  %v2238_v41 = vpop.xlane.xlu1 %2237  ;;  %v3733_v40 = vld [vmem:[%s5237_s3 + $0x30] sm:$0xff] }
 0xf34   : > { %4515 = vrcp.f32 %v2238_v41 }
 0xf36   : > { %v2428_v42 = vpop.permute.xlu0 %2427 }
 0xf37   : > { %4099 = vmatprep.mubr.msk.f32.mxu1 %vm496_vm1, %v2428_v42  ;;  %v2521_v31 = vpop.permute.xlu1 %2520 }
 0xf38   : > { %4100 = vmatmul.mubr.msk.f32.vlgmr.msra.gmra.mrb[24].mxu1 %vm496_vm1, %v2430_v21 }
 0xf3a   : > { %v2519_v32 = vpop.permute.xlu0 %2518 }
 0xf3d   : > { %v4514_v43 = vpop.eup %4513 }
 0xf3e   : > { %v4516_v30 = vpop.eup %4515  ;;  %v2249_v29 = vmul.f32 %v4514_v43, %v4506_v10 }
 0xf3f   : > { %v2248_v44 = vmul.f32 %v4516_v30, %v4508_v50 }
 0xf41   : > { %4092 = vmatprep.mubr.msk.f32.mxu0 %vm496_vm1, %v2248_v44 }
 0xf42   : > { %4093 = vmatmul.mubr.msk.f32.vlgmr.msra.gmra.mrb[18].mxu0 %vm496_vm1, %v2249_v29 }
 0xf43   : > { %4298 = vmatpush3.bf16.xpose.msk.msra.mxu0 %vm4697_vm2, %v4293_v16  ;;  %4106 = vmatprep.mubr.msk.f32.mxu0 %vm496_vm1, %v2519_v32 }
 0xf4a   : > { %4107 = vmatmul.mubr.msk.f32.vlgmr.msra.gmra.mrb[20].mxu0 %vm496_vm1, %v2521_v31 }
 0xfe0   : > { %v5045_v48 = vpop.f32.mrb[16].mxu0 }
 0xfe1   : > { %v5047_v7 = vpop.f32.mrb[17].mxu0 }
0x100b   : > { %v4101_v6 = vpop.f32.mrb[24].mxu1 }
0x100c   : > { %v2610_v51 = vmul.f32 0.25, %v4101_v6  ;;  %v2509_v52 = vpop.f32.mrb[25].mxu1 }
0x100d   : > { %v2609_v54 = vmul.f32 0.25, %v2509_v52 }
0x100e   : > { %v2614_v55 = vadd.f32 %v2610_v51, %v4731_v56 }
0x100f   : > { %v2613_v57 = vadd.f32 %v2609_v54, %v4729_v53 }
0x1010   : > { %v2620_v24 = vsel %vm496_vm1, %v2614_v55, -inf }
0x1011   : > { %2621 = vmax.xlane.f32.xlu1 %v2620_v24  ;;  %v2617_v58 = vsel %vm496_vm1, %v2613_v57, -inf  ;;  %v3720_v24 = vld [vmem:[%s5237_s3 + $0x28] sm:$0xff] }
0x1012   : > { %2618 = vmax.xlane.f32.xlu0 %v2617_v58 }
0x1015   : > { %v5053_v59 = vpop.f32.mrb[18].mxu0 }
0x1016   : > { %v5055_v61 = vpop.f32.mrb[19].mxu0 }
0x101d   : > { %v4108_v62 = vpop.f32.mrb[20].mxu0 }
0x101e   : > { %v2600_v63 = vpop.f32.mrb[21].mxu0  ;;  %v2612_v9 = vmul.f32 0.25, %v4108_v62 }
0x101f   : > { %v2611_v8 = vmul.f32 0.25, %v2600_v63 }
0x1020   : > { %v2616_v53 = vadd.f32 %v2612_v9, %v4738_v1 }
0x1021   : > { %v2615_v17 = vadd.f32 %v2611_v8, %v4734_v60 }
0x1022   : > { %v2626_v3 = vsel %vm496_vm1, %v2616_v53, -inf }
0x1023   : > { %v2623_v56 = vsel %vm496_vm1, %v2615_v17, -inf }
0x1024   : > { %2624 = vmax.xlane.f32.xlu0 %v2623_v56 }
0x1028   : > { %2627 = vmax.xlane.f32.xlu0 %v2626_v3 }
0x109e   : > { %v2622_v47 = vpop.xlane.xlu1 %2621 }
0x109f   : > { %v2630_v46 = vsub.f32 %v2614_v55, %v2622_v47  ;;  %v2619_v11 = vpop.xlane.xlu0 %2618 }
0x10a0   : > { %v2629_v13 = vsub.f32 %v2613_v57, %v2619_v11  ;;  %v3719_v57 = vld [vmem:[%s5237_s3 + $0x20] sm:$0xff] }
0x10a1   : > { %v2635_v18 = vmul.f32 1.442695, %v2630_v46  ;;  %v4311_v58 = vpack.c.bf16 %v3720_v24, %v3719_v57  ;;  %v3747_v24 = vld [vmem:[%s5240_s6 + $0xc] ss:$0 sm:$0xff] }
0x10a2   : > { %v2633_v23 = vmul.f32 1.442695, %v2629_v13 }
0x10a3   : > { %4517 = vpow2.f32 %v2635_v18 }
0x10a4   : > { %4519 = vpow2.f32 %v2633_v23 }
0x10ad   : > { %v4518_v10 = vpop.eup %4517 }
0x10ae   : > { %v4520_v50 = vpop.eup %4519  ;;  %v2644_v60 = vsel %vm496_vm1, %v4518_v10, 0.0 }
0x10af   : > { %2645 = vadd.xlane.f32.xlu0 %v2644_v60  ;;  %v2641_v25 = vsel %vm496_vm1, %v4520_v50, 0.0 }
0x10b0   : > { %2642 = vadd.xlane.f32.xlu1 %v2641_v25 }
0x10b1   : > { %v2625_v1 = vpop.xlane.xlu0 %2624 }
0x10b2   : > { %v2631_v49 = vsub.f32 %v2615_v17, %v2625_v1  ;;  %v3744_v17 = vld [vmem:[%s5240_s6 + $0x9] ss:$0 sm:$0xff] }
0x10b4   : > { %v2637_v26 = vmul.f32 1.442695, %v2631_v49 }
0x10b5   : > { %v2628_v19 = vpop.xlane.xlu0 %2627 }
0x10b6   : > { %4521 = vpow2.f32 %v2637_v26  ;;  %v2632_v27 = vsub.f32 %v2616_v53, %v2628_v19 }
0x10b8   : > { %v2639_v28 = vmul.f32 1.442695, %v2632_v27 }
0x10ba   : > { %4523 = vpow2.f32 %v2639_v28 }
0x10c0   : > { %v4522_v14 = vpop.eup %4521 }
0x10c1   : > { %v2647_v12 = vsel %vm496_vm1, %v4522_v14, 0.0 }
0x10c2   : > { %2648 = vadd.xlane.f32.xlu1 %v2647_v12 }
0x10c4   : > { %v4524_v33 = vpop.eup %4523 }
0x10c5   : > { %v2650_v35 = vsel %vm496_vm1, %v4524_v33, 0.0 }
0x10c6   : > { %2651 = vadd.xlane.f32.xlu0 %v2650_v35 }
0x10d3   : > { %4436 = vrot.lane.b32.xlu1 %v4973_v20, %s4580_s9  ;;  %v3734_v20 = vld [vmem:[%s5237_s3 + $0x38] sm:$0xff] }
0x10d4   : > { %v4307_v43 = vpack.c.bf16 %v3734_v20, %v3733_v40  ;;  %v3751_v20 = vld [vmem:[%s5238_s4 + $0x30] sm:$0xff] }
0x10dc   : > { %4441 = vrot.lane.b32.xlu0 %v4985_v22, %s4580_s9 }
0x113c   : > { %v2646_v38 = vpop.xlane.xlu0 %2645 }
0x113d   : > { %v2643_v36 = vpop.xlane.xlu1 %2642 }
0x113e   : > { %4525 = vrcp.f32 %v2643_v36 }
0x113f   : > { %4527 = vrcp.f32 %v2646_v38 }
0x1148   : > { %v4526_v37 = vpop.eup %4525 }
0x1149   : > { %v2657_v15 = vmul.f32 %v4526_v37, %v4520_v50  ;;  %v4528_v30 = vpop.eup %4527 }
0x114a   : > { %v2658_v6 = vmul.f32 %v4528_v30, %v4518_v10 }
0x114b   : > { %4113 = vmatprep.mubr.msk.f32.mxu1 %vm496_vm1, %v2657_v15 }
0x114f   : > { %v2649_v39 = vpop.xlane.xlu1 %2648 }
0x1150   : > { %4529 = vrcp.f32 %v2649_v39 }
0x1153   : > { %v4437_v16 = vpop.permute.xlu1 %4436  ;;  %v2652_v21 = vpop.xlane.xlu0 %2651 }
0x1154   : > { %v4439_v22 = vunpack.i.h.bf16 %v4437_v16  ;;  %v4438_v41 = vunpack.i.l.bf16 %v4437_v16  ;;  %4531 = vrcp.f32 %v2652_v21  ;;  %v3749_v16 = vld [vmem:[%s5238_s4 + $0x20] sm:$0xff]  ;;  %v3750_v21 = vld [vmem:[%s5238_s4 + $0x28] sm:$0xff] }
0x1155   : > { %v4315_v40 = vpack.c.bf16 %v3750_v21, %v3749_v16 }
0x1156   : > { %v4299_v42 = vpack.c.bf16 %v4439_v22, %v4438_v41  ;;  %v3752_v22 = vld [vmem:[%s5238_s4 + $0x38] sm:$0xff] }
0x1157   : > { %v4442_v44 = vpop.permute.xlu0 %4441  ;;  %v4319_v41 = vpack.c.bf16 %v3752_v22, %v3751_v20 }
0x1158   : > { %v4444_v29 = vunpack.i.h.bf16 %v4442_v44  ;;  %v4443_v32 = vunpack.i.l.bf16 %v4442_v44  ;;  %4300 = vmatprep.subr.bf16.mxu1 %v4299_v42 }
0x1159   : > { %4302 = vmatpush3.bf16.msra.mxu1 %v4299_v42 }
0x115a   : > { %v4530_v31 = vpop.eup %4529  ;;  %v4303_v51 = vpack.c.bf16 %v4444_v29, %v4443_v32  ;;  %4308 = vmatprep.subr.bf16.mxu1 %v4307_v43 }
0x115b   : > { %v2659_v52 = vmul.f32 %v4530_v31, %v4522_v14 }
0x115c   : > { %4114 = vmatmul.mubr.msk.f32.vlgmr.msra.gmra.mrb[26].mxu1 %vm496_vm1, %v2658_v6  ;;  %4304 = vmatprep.subr.bf16.mxu0 %v4303_v51 }
0x115d   : > { %4306 = vmatpush3.bf16.msra.mxu0 %v4303_v51  ;;  %4120 = vmatprep.mubr.msk.f32.mxu0 %vm496_vm1, %v2659_v52 }
0x115e   : > { %v4532_v54 = vpop.eup %4531  ;;  %4310 = vmatpush3.bf16.msra.mxu1 %v4307_v43  ;;  %4316 = vmatprep.subr.bf16.mxu0 %v4315_v40 }
0x115f   : > { %v2660_v55 = vmul.f32 %v4532_v54, %v4524_v33  ;;  %4312 = vmatprep.subr.bf16.mxu1 %v4311_v58 }
0x1161   : > { %4121 = vmatmul.mubr.msk.f32.vlgmr.msra.gmra.mrb[22].mxu0 %vm496_vm1, %v2660_v55 }
0x1162   : > { %4318 = vmatpush3.bf16.msra.mxu0 %v4315_v40 }
0x1163   : > { %4320 = vmatprep.subr.bf16.mxu0 %v4319_v41 }
0x1166   : > { %4322 = vmatpush3.bf16.msra.mxu0 %v4319_v41 }
0x122f   : > { %v4115_v62 = vpop.f32.mrb[26].mxu1 }
0x1230   : > { %v2739_v63 = vpop.f32.mrb[27].mxu1 }
0x1231   : > { %4127 = vmatprep.mubr.msk.f32.mxu1 %vm496_vm1, %v2739_v63 }
0x1232   : > { %4128 = vmatmul.mubr.msk.f32.vlgmr.msra.gmra.mrb[28].mxu1 %vm496_vm1, %v4115_v62 }
0x1233   : > { %4314 = vmatpush3.bf16.msra.mxu1 %v4311_v58 }
0x1234   : > { %v4122_v9 = vpop.f32.mrb[22].mxu0 }
0x1235   : > { %v2826_v8 = vpop.f32.mrb[23].mxu0 }
0x1236   : > { %4130 = vmatprep.mubr.msk.f32.mxu1 %vm496_vm1, %v2826_v8 }
0x1237   : > { %4131 = vmatmul.mubr.msk.f32.gmra.mrb[30].mxu1 %vm496_vm1, %v4122_v9  ;;  %v3748_v9 = vld [vmem:[%s5240_s6 + $0xd] ss:$0 sm:$0xff] }
0x1238   : > { %4137 = vmatprep.mubr.msk.f32.mxu1 %vm496_vm1, %v5047_v7 }
0x123b   : > { %4138 = vmatmul.mubr.msk.f32.vlgmr.msra.gmra.mrb[28].mxu1 %vm496_vm1, %v5045_v48 }
0x123c   : > { %4140 = vmatprep.mubr.msk.f32.mxu1 %vm496_vm1, %v5055_v61 }
0x123f   : > { %4141 = vmatmul.mubr.msk.f32.gmra.mrb[30].mxu1 %vm496_vm1, %v5053_v59  ;;  %vm3569_vm1 = vcmask 123904  }
0x130e   : > { %v4139_v56 = vpop.f32.mrb[28].mxu1 }
0x130f   : > { %v3037_v53 = vadd.f32 %v4139_v56, %v3744_v17  ;;  %v3012_v3 = vpop.f32.mrb[29].mxu1 }
0x1310   : > { %v3036_v47 = vadd.f32 %v3744_v17, %v3012_v3 }
0x1311   : > { %v3041_v46 = vadd.f32 %v3037_v53, %v4948_v2 }
0x1312   : > { %v4142_v7 = vpop.f32.mrb[30].mxu1  ;;  %v3040_v11 = vadd.f32 %v3036_v47, %v4946_v0 }
0x1313   : > { %v3039_v48 = vadd.f32 %v4142_v7, %v3744_v17  ;;  %v3022_v13 = vpop.f32.mrb[31].mxu1  ;;  %v3049_v61 = vsel %vm392_vm0, %v3041_v46, 0.0 }
0x1314   : > { %v3038_v18 = vadd.f32 %v3744_v17, %v3022_v13  ;;  %3050 = vadd.xlane.f32.xlu0 %v3049_v61  ;;  %v3046_v59 = vsel %vm392_vm0, %v3040_v11, 0.0 }
0x1315   : > { %3047 = vadd.xlane.f32.xlu1 %v3046_v59  ;;  %v3043_v23 = vadd.f32 %v3039_v48, %v4956_v5  ;;  %v3760_v59 = vld [vmem:[%s5239_s5 + $0x48] sm:$0xff] }
0x1316   : > { %v3042_v10 = vadd.f32 %v3038_v18, %v4954_v4  ;;  %v3759_v18 = vld [vmem:[%s5239_s5 + $0x40] sm:$0xff] }
0x1317   : > { %v3055_v50 = vsel %vm392_vm0, %v3043_v23, 0.0 }
0x1318   : > { %3056 = vadd.xlane.f32.xlu0 %v3055_v50  ;;  %v3052_v2 = vsel %vm392_vm0, %v3042_v10, 0.0  ;;  %v3762_v50 = vld [vmem:[%s5239_s5 + $0x58] sm:$0xff] }
0x1319   : > { %3053 = vadd.xlane.f32.xlu1 %v3052_v2 }
0x13a1   : > { %v3051_v0 = vpop.xlane.xlu0 %3050 }
0x13a2   : > { %v3059_v60 = vmul.f32 0.03125, %v3051_v0  ;;  %v3048_v25 = vpop.xlane.xlu1 %3047  ;;  %v3763_v0 = vld [vmem:[%s5239_s5 + $0x60] sm:$0xff] }
0x13a3   : > { %v3058_v1 = vmul.f32 0.03125, %v3048_v25 }
0x13a4   : > { %v3063_v49 = vsub.f32 %v3041_v46, %v3059_v60  ;;  %v3764_v60 = vld [vmem:[%s5239_s5 + $0x68] sm:$0xff] }
0x13a5   : > { %v3062_v26 = vsub.f32 %v3040_v11, %v3058_v1  ;;  %v3057_v19 = vpop.xlane.xlu0 %3056  ;;  %v4331_v25 = vpack.c.bf16 %v3764_v60, %v3763_v0  ;;  %v3765_v1 = vld [vmem:[%s5239_s5 + $0x70] sm:$0xff] }
0x13a6   : > { %v3061_v27 = vmul.f32 0.03125, %v3057_v19  ;;  %v3054_v28 = vpop.xlane.xlu1 %3053  ;;  %v3067_v14 = vmul.f32 %v3063_v49, %v3063_v49  ;;  %v3754_v19 = vld [vmem:[%s5240_s6 + $0xa] ss:$0 sm:$0xff] }
0x13a7   : > { %v3060_v12 = vmul.f32 0.03125, %v3054_v28  ;;  %v3066_v5 = vmul.f32 %v3062_v26, %v3062_v26 }
0x13a8   : > { %v3065_v33 = vsub.f32 %v3043_v23, %v3061_v27  ;;  %v3073_v4 = vsel %vm392_vm0, %v3067_v14, 0.0  ;;  %v4323_v23 = vpack.c.bf16 %v3760_v59, %v3759_v18 }
0x13a9   : > { %v3064_v35 = vsub.f32 %v3042_v10, %v3060_v12  ;;  %3074 = vadd.xlane.f32.xlu0 %v3073_v4  ;;  %v3070_v36 = vsel %vm392_vm0, %v3066_v5, 0.0  ;;  %v3761_v10 = vld [vmem:[%s5239_s5 + $0x50] sm:$0xff] }
0x13aa   : > { %3071 = vadd.xlane.f32.xlu1 %v3070_v36  ;;  %v3069_v37 = vmul.f32 %v3065_v33, %v3065_v33  ;;  %4324 = vmatprep.subr.bf16.mxu0 %v4323_v23  ;;  %v4327_v2 = vpack.c.bf16 %v3762_v50, %v3761_v10 }
0x13ab   : > { %v3068_v15 = vmul.f32 %v3064_v35, %v3064_v35 }
0x13ac   : > { %v3079_v38 = vsel %vm392_vm0, %v3069_v37, 0.0 }
0x13ad   : > { %3080 = vadd.xlane.f32.xlu0 %v3079_v38  ;;  %v3076_v39 = vsel %vm392_vm0, %v3068_v15, 0.0 }
0x13ae   : > { %3077 = vadd.xlane.f32.xlu1 %v3076_v39 }
0x1436   : > { %v3075_v42 = vpop.xlane.xlu0 %3074 }
0x1437   : > { %v3083_v43 = vmul.f32 0.03125, %v3075_v42  ;;  %v3072_v30 = vpop.xlane.xlu1 %3071 }
0x1438   : > { %v3082_v44 = vmul.f32 0.03125, %v3072_v30 }
0x1439   : > { %v3087_v29 = vadd.f32 1e-05, %v3083_v43 }
0x143a   : > { %v3086_v32 = vadd.f32 1e-05, %v3082_v44  ;;  %v3081_v31 = vpop.xlane.xlu0 %3080 }
0x143b   : > { %4533 = vrsqrt.f32 %v3087_v29  ;;  %v3085_v6 = vmul.f32 0.03125, %v3081_v31  ;;  %v3078_v51 = vpop.xlane.xlu1 %3077 }
0x143c   : > { %4535 = vrsqrt.f32 %v3086_v32  ;;  %v3084_v52 = vmul.f32 0.03125, %v3078_v51 }
0x143d   : > { %v3089_v54 = vadd.f32 1e-05, %v3085_v6 }
0x143e   : > { %v3088_v55 = vadd.f32 1e-05, %v3084_v52 }
0x143f   : > { %4537 = vrsqrt.f32 %v3089_v54 }
0x1440   : > { %4539 = vrsqrt.f32 %v3088_v55 }
0x1445   : > { %v4534_v57 = vpop.eup %4533 }
0x1446   : > { %v4536_v58 = vpop.eup %4535  ;;  %v3095_v62 = vmul.f32 %v4534_v57, %v3063_v49  ;;  %v3766_v49 = vld [vmem:[%s5239_s5 + $0x78] sm:$0xff] }
0x1447   : > { %v3094_v63 = vmul.f32 %v4536_v58, %v3062_v26  ;;  %v4335_v26 = vpack.c.bf16 %v3766_v49, %v3765_v1 }
0x1448   : > { %v3103_v8 = vmul.f32 %v3747_v24, %v3095_v62 }
0x1449   : > { %v4538_v17 = vpop.eup %4537  ;;  %v3102_v56 = vmul.f32 %v3747_v24, %v3094_v63 }
0x144a   : > { %v4540_v53 = vpop.eup %4539  ;;  %v3097_v3 = vmul.f32 %v4538_v17, %v3065_v33  ;;  %v5132_v7 = vadd.f32 %v3748_v9, %v3103_v8 }
0x144b   : > { %v5130_v47 = vadd.f32 %v3748_v9, %v3102_v56  ;;  %v3096_v46 = vmul.f32 %v4540_v53, %v3064_v35 }
0x144c   : > { %v3105_v11 = vmul.f32 %v3747_v24, %v3097_v3 }
0x144d   : > { %4151 = vmatprep.mubr.msk.f32.mxu0 %vm392_vm0, %v5130_v47  ;;  %v3104_v48 = vmul.f32 %v3747_v24, %v3096_v46 }
0x144e   : > { %4152 = vmatmul.mubr.msk.f32.vlgmr.msra.gmra.mrb[24].mxu0 %vm392_vm0, %v5132_v7  ;;  %v5140_v61 = vadd.f32 %v3748_v9, %v3105_v11 }
0x144f   : > { %v5138_v13 = vadd.f32 %v3748_v9, %v3104_v48  ;;  %4326 = vmatpush3.bf16.msra.mxu0 %v4323_v23  ;;  %v3768_v48 = vld [vmem:[%s5240_s6 + $0xb] ss:$0 sm:$0xff] }
0x1450   : > { %4328 = vmatprep.subr.bf16.mxu0 %v4327_v2 }
0x1451   : > { %4154 = vmatprep.mubr.msk.f32.mxu0 %vm392_vm0, %v5138_v13 }
0x1452   : > { %4155 = vmatmul.mubr.msk.f32.gmra.mrb[26].mxu0 %vm392_vm0, %v5140_v61 }
0x1453   : > { %4330 = vmatpush3.bf16.msra.mxu0 %v4327_v2 }
0x1454   : > { %4332 = vmatprep.subr.bf16.mxu0 %v4331_v25 }
0x1457   : > { %4334 = vmatpush3.bf16.msra.mxu0 %v4331_v25 }
0x1458   : > { %4336 = vmatprep.subr.bf16.mxu0 %v4335_v26 }
0x145b   : > { %4338 = vmatpush3.bf16.msra.mxu0 %v4335_v26 }
0x1521   : > { %v4153_v27 = vpop.f32.mrb[24].mxu0 }
0x1522   : > { %v3208_v28 = vadd.f32 %v4153_v27, %v3754_v19  ;;  %v3202_v14 = vpop.f32.mrb[25].mxu0 }
0x1523   : > { %v3203_v12 = vadd.f32 %v3754_v19, %v3202_v14 }
0x1524   : > { %v3222_v5 = vmul.f32 %v3208_v28, %v3208_v28 }
0x1525   : > { %v3221_v33 = vmul.f32 %v3203_v12, %v3203_v12  ;;  %v4156_v4 = vpop.f32.mrb[26].mxu0 }
0x1526   : > { %v3226_v35 = vmul.f32 %v3222_v5, %v3208_v28  ;;  %v3218_v36 = vadd.f32 %v4156_v4, %v3754_v19  ;;  %v3212_v37 = vpop.f32.mrb[27].mxu0 }
0x1527   : > { %v3225_v15 = vmul.f32 %v3221_v33, %v3203_v12  ;;  %v3213_v38 = vadd.f32 %v3754_v19, %v3212_v37 }
0x1528   : > { %v3230_v39 = vmul.f32 0.044715, %v3226_v35  ;;  %v3224_v16 = vmul.f32 %v3218_v36, %v3218_v36 }
0x1529   : > { %v3229_v21 = vmul.f32 0.044715, %v3225_v15  ;;  %v3223_v40 = vmul.f32 %v3213_v38, %v3213_v38 }
0x152a   : > { %v3234_v20 = vadd.f32 %v3230_v39, %v3208_v28  ;;  %v3228_v22 = vmul.f32 %v3224_v16, %v3218_v36 }
0x152b   : > { %v3233_v41 = vadd.f32 %v3229_v21, %v3203_v12  ;;  %v3227_v42 = vmul.f32 %v3223_v40, %v3213_v38 }
0x152c   : > { %v3238_v43 = vmul.f32 0.7978846, %v3234_v20  ;;  %v3232_v30 = vmul.f32 0.044715, %v3228_v22 }
0x152d   : > { %v3237_v44 = vmul.f32 0.7978846, %v3233_v41  ;;  %v3231_v29 = vmul.f32 0.044715, %v3227_v42 }
0x152e   : > { %4541 = vtanh.f32 %v3238_v43  ;;  %v3236_v32 = vadd.f32 %v3232_v30, %v3218_v36 }
0x152f   : > { %4543 = vtanh.f32 %v3237_v44  ;;  %v3235_v31 = vadd.f32 %v3231_v29, %v3213_v38 }
0x1530   : > { %v3240_v6 = vmul.f32 0.7978846, %v3236_v32 }
0x1531   : > { %v3239_v51 = vmul.f32 0.7978846, %v3235_v31 }
0x1532   : > { %4545 = vtanh.f32 %v3240_v6 }
0x1533   : > { %4547 = vtanh.f32 %v3239_v51 }
0x1538   : > { %v4542_v52 = vpop.eup %4541 }
0x1539   : > { %v4544_v54 = vpop.eup %4543  ;;  %v3246_v55 = vadd.f32 1.0, %v4542_v52 }
0x153a   : > { %v3245_v57 = vadd.f32 1.0, %v4544_v54 }
0x153b   : > { %v3250_v24 = vmul.f32 0.5, %v3246_v55 }
0x153c   : > { %v4546_v58 = vpop.eup %4545  ;;  %v3249_v62 = vmul.f32 0.5, %v3245_v57 }
0x153d   : > { %v4548_v63 = vpop.eup %4547  ;;  %v3248_v9 = vadd.f32 1.0, %v4546_v58  ;;  %v3254_v56 = vmul.f32 %v3250_v24, %v3208_v28  ;;  %v3775_v24 = vld [vmem:[%s5240_s6 + $0xe] ss:$0 sm:$0xff] }
0x153e   : > { %v3253_v8 = vmul.f32 %v3249_v62, %v3203_v12  ;;  %v3247_v17 = vadd.f32 1.0, %v4548_v63  ;;  %v3776_v63 = vld [vmem:[%s5240_s6 + $0xf] ss:$0 sm:$0xff] }
0x153f   : > { %v3252_v53 = vmul.f32 0.5, %v3248_v9 }
0x1540   : > { %4173 = vmatprep.mubr.msk.f32.mxu0 %vm1740_vm14, %v3253_v8  ;;  %v3251_v3 = vmul.f32 0.5, %v3247_v17 }
0x1541   : > { %4174 = vmatmul.mubr.msk.f32.vlgmr.msra.gmra.mrb[28].mxu0 %vm1740_vm14, %v3254_v56  ;;  %v3256_v11 = vmul.f32 %v3252_v53, %v3218_v36 }
0x1542   : > { %v3255_v46 = vmul.f32 %v3251_v3, %v3213_v38 }
0x1544   : > { %4176 = vmatprep.mubr.msk.f32.mxu0 %vm1740_vm14, %v3255_v46 }
0x1545   : > { %4177 = vmatmul.mubr.msk.f32.gmra.mrb[30].mxu0 %vm1740_vm14, %v3256_v11 }
0x1614   : > { %v4175_v18 = vpop.f32.mrb[28].mxu0 }
0x1615   : > { %v3355_v59 = vadd.f32 %v4175_v18, %v3768_v48  ;;  %v3349_v23 = vpop.f32.mrb[29].mxu0 }
0x1616   : > { %v3350_v10 = vadd.f32 %v3768_v48, %v3349_v23 }
0x1617   : > { %v3369_v50 = vadd.f32 %v3355_v59, %v5132_v7 }
0x1618   : > { %v4178_v2 = vpop.f32.mrb[30].mxu0  ;;  %v3368_v0 = vadd.f32 %v3350_v10, %v5130_v47 }
0x1619   : > { %v3365_v60 = vadd.f32 %v4178_v2, %v3768_v48  ;;  %v3359_v25 = vpop.f32.mrb[31].mxu0  ;;  %v3377_v1 = vsel %vm392_vm0, %v3369_v50, 0.0 }
0x161a   : > { %v3360_v49 = vadd.f32 %v3768_v48, %v3359_v25  ;;  %3378 = vadd.xlane.f32.xlu0 %v3377_v1  ;;  %v3374_v26 = vsel %vm392_vm0, %v3368_v0, 0.0 }
0x161b   : > { %3375 = vadd.xlane.f32.xlu1 %v3374_v26  ;;  %v3371_v19 = vadd.f32 %v3365_v60, %v5140_v61 }
0x161c   : > { %v3370_v27 = vadd.f32 %v3360_v49, %v5138_v13 }
0x161d   : > { %v3383_v28 = vsel %vm392_vm0, %v3371_v19, 0.0 }
0x161e   : > { %3384 = vadd.xlane.f32.xlu0 %v3383_v28  ;;  %v3380_v7 = vsel %vm392_vm0, %v3370_v27, 0.0 }
0x161f   : > { %3381 = vadd.xlane.f32.xlu1 %v3380_v7 }
0x16a7   : > { %v3379_v47 = vpop.xlane.xlu0 %3378 }
0x16a8   : > { %v3387_v14 = vmul.f32 0.03125, %v3379_v47  ;;  %v3376_v12 = vpop.xlane.xlu1 %3375 }
0x16a9   : > { %v3386_v5 = vmul.f32 0.03125, %v3376_v12 }
0x16aa   : > { %v3391_v33 = vsub.f32 %v3369_v50, %v3387_v14 }
0x16ab   : > { %v3390_v4 = vsub.f32 %v3368_v0, %v3386_v5  ;;  %v3385_v35 = vpop.xlane.xlu0 %3384 }
0x16ac   : > { %v3389_v36 = vmul.f32 0.03125, %v3385_v35  ;;  %v3382_v37 = vpop.xlane.xlu1 %3381  ;;  %v3395_v15 = vmul.f32 %v3391_v33, %v3391_v33 }
0x16ad   : > { %v3388_v38 = vmul.f32 0.03125, %v3382_v37  ;;  %v3394_v61 = vmul.f32 %v3390_v4, %v3390_v4 }
0x16ae   : > { %v3393_v39 = vsub.f32 %v3371_v19, %v3389_v36  ;;  %v3401_v13 = vsel %vm392_vm0, %v3395_v15, 0.0 }
0x16af   : > { %v3392_v16 = vsub.f32 %v3370_v27, %v3388_v38  ;;  %3402 = vadd.xlane.f32.xlu0 %v3401_v13  ;;  %v3398_v21 = vsel %vm392_vm0, %v3394_v61, 0.0 }
0x16b0   : > { %3399 = vadd.xlane.f32.xlu1 %v3398_v21  ;;  %v3397_v40 = vmul.f32 %v3393_v39, %v3393_v39 }
0x16b1   : > { %v3396_v20 = vmul.f32 %v3392_v16, %v3392_v16 }
0x16b2   : > { %v3407_v22 = vsel %vm392_vm0, %v3397_v40, 0.0 }
0x16b3   : > { %3408 = vadd.xlane.f32.xlu0 %v3407_v22  ;;  %v3404_v41 = vsel %vm392_vm0, %v3396_v20, 0.0 }
0x16b4   : > { %3405 = vadd.xlane.f32.xlu1 %v3404_v41 }
0x173c   : > { %v3403_v42 = vpop.xlane.xlu0 %3402 }
0x173d   : > { %v3411_v43 = vmul.f32 0.03125, %v3403_v42  ;;  %v3400_v30 = vpop.xlane.xlu1 %3399 }
0x173e   : > { %v3410_v44 = vmul.f32 0.03125, %v3400_v30 }
0x173f   : > { %v3415_v29 = vadd.f32 1e-05, %v3411_v43 }
0x1740   : > { %v3414_v32 = vadd.f32 1e-05, %v3410_v44  ;;  %v3409_v31 = vpop.xlane.xlu0 %3408 }
0x1741   : > { %4549 = vrsqrt.f32 %v3415_v29  ;;  %v3413_v6 = vmul.f32 0.03125, %v3409_v31  ;;  %v3406_v51 = vpop.xlane.xlu1 %3405  ;;  %v3777_v31 = vld [vmem:[%s5241_s7] ss:$0 sm:$0xff] }
0x1742   : > { %4551 = vrsqrt.f32 %v3414_v32  ;;  %v3412_v52 = vmul.f32 0.03125, %v3406_v51 }
0x1743   : > { %v3417_v54 = vadd.f32 1e-05, %v3413_v6 }
0x1744   : > { %v3416_v55 = vadd.f32 1e-05, %v3412_v52  ;;  %v3778_v52 = vld [vmem:[%s5241_s7 + $0x1] ss:$0 sm:$0xff] }
0x1745   : > { %4553 = vrsqrt.f32 %v3417_v54 }
0x1746   : > { %4555 = vrsqrt.f32 %v3416_v55 }
0x174b   : > { %v4550_v57 = vpop.eup %4549 }
0x174c   : > { %v4552_v58 = vpop.eup %4551  ;;  %v3423_v62 = vmul.f32 %v4550_v57, %v3391_v33 }
0x174d   : > { %v3422_v9 = vmul.f32 %v4552_v58, %v3390_v4 }
0x174e   : > { %v3431_v8 = vmul.f32 %v3775_v24, %v3423_v62 }
0x174f   : > { %v4554_v17 = vpop.eup %4553  ;;  %v3430_v56 = vmul.f32 %v3775_v24, %v3422_v9 }
0x1750   : > { %v4556_v53 = vpop.eup %4555  ;;  %v3439_v3 = vadd.f32 %v3776_v63, %v3431_v8  ;;  %v3425_v46 = vmul.f32 %v4554_v17, %v3393_v39  ;;  %v3533_v39 = vld [vmem:[%s5241_s7 + $0x3] sm:$0x1] }
0x1751   : > { %v3438_v11 = vadd.f32 %v3776_v63, %v3430_v56  ;;  %v3424_v48 = vmul.f32 %v4556_v53, %v3392_v16  ;;  %4347 = vpush %v3533_v39 }
0x1752   : > { %v3447_v18 = vsel %vm392_vm0, %v3439_v3, 0.0  ;;  %v3433_v59 = vmul.f32 %v3775_v24, %v3425_v46 }
0x1753   : > { %3448 = vadd.xlane.f32.xlu0 %v3447_v18  ;;  %v3444_v23 = vsel %vm392_vm0, %v3438_v11, 0.0  ;;  %v3432_v10 = vmul.f32 %v3775_v24, %v3424_v48  ;;  %v3779_v24 = vld [vmem:[%s5241_s7 + $0x2] ss:$0 sm:$0xff] }
0x1754   : > { %3445 = vadd.xlane.f32.xlu1 %v3444_v23  ;;  %v3441_v50 = vadd.f32 %v3776_v63, %v3433_v59 }
0x1755   : > { %v3440_v2 = vadd.f32 %v3776_v63, %v3432_v10 }
0x1756   : > { %v3453_v0 = vsel %vm392_vm0, %v3441_v50, 0.0 }
0x1757   : > { %3454 = vadd.xlane.f32.xlu0 %v3453_v0  ;;  %v3450_v60 = vsel %vm392_vm0, %v3440_v2, 0.0  ;;  %v3550_v0 = vadd.s32 4294967288, %v4723_v45 }
0x1758   : > { %3451 = vadd.xlane.f32.xlu1 %v3450_v60 }
0x1782   : > { %s4348_s23 = spop %4347 }
0x1783   : > { %v3536_v60 = vstv %s4348_s23 }
0x17e0   : > { %v3449_v25 = vpop.xlane.xlu0 %3448 }
0x17e1   : > { %v3457_v1 = vmul.f32 0.03125, %v3449_v25  ;;  %v3446_v49 = vpop.xlane.xlu1 %3445 }
0x17e2   : > { %v3456_v26 = vmul.f32 0.03125, %v3446_v49  ;;  %v3553_v49 = vsub.s32 %v3550_v0, %v4719_v34 }
0x17e3   : > { %v3461_v19 = vsub.f32 %v3439_v3, %v3457_v1 }
0x17e4   : > { %v3460_v27 = vsub.f32 %v3438_v11, %v3456_v26  ;;  %v3455_v28 = vpop.xlane.xlu0 %3454 }
0x17e5   : > { %v3459_v7 = vmul.f32 0.03125, %v3455_v28  ;;  %v3452_v47 = vpop.xlane.xlu1 %3451  ;;  %v3465_v14 = vmul.f32 %v3461_v19, %v3461_v19 }
0x17e6   : > { %v3458_v12 = vmul.f32 0.03125, %v3452_v47  ;;  %v3464_v5 = vmul.f32 %v3460_v27, %v3460_v27 }
0x17e7   : > { %v3463_v33 = vsub.f32 %v3441_v50, %v3459_v7  ;;  %v3471_v4 = vsel %vm392_vm0, %v3465_v14, 0.0 }
0x17e8   : > { %v3462_v35 = vsub.f32 %v3440_v2, %v3458_v12  ;;  %3472 = vadd.xlane.f32.xlu0 %v3471_v4  ;;  %v3468_v36 = vsel %vm392_vm0, %v3464_v5, 0.0 }
0x17e9   : > { %3469 = vadd.xlane.f32.xlu1 %v3468_v36  ;;  %v3467_v37 = vmul.f32 %v3463_v33, %v3463_v33 }
0x17ea   : > { %v3466_v15 = vmul.f32 %v3462_v35, %v3462_v35 }
0x17eb   : > { %v3477_v38 = vsel %vm392_vm0, %v3467_v37, 0.0 }
0x17ec   : > { %3478 = vadd.xlane.f32.xlu0 %v3477_v38  ;;  %v3474_v61 = vsel %vm392_vm0, %v3466_v15, 0.0 }
0x17ed   : > { %3475 = vadd.xlane.f32.xlu1 %v3474_v61 }
0x1875   : > { %v3473_v13 = vpop.xlane.xlu0 %3472 }
0x1876   : > { %v3481_v16 = vmul.f32 0.03125, %v3473_v13  ;;  %v3470_v21 = vpop.xlane.xlu1 %3469 }
0x1877   : > { %v3480_v40 = vmul.f32 0.03125, %v3470_v21 }
0x1878   : > { %v3485_v20 = vadd.f32 1e-05, %v3481_v16 }
0x1879   : > { %v3484_v22 = vadd.f32 1e-05, %v3480_v40  ;;  %v3479_v41 = vpop.xlane.xlu0 %3478 }
0x187a   : > { %4557 = vrsqrt.f32 %v3485_v20  ;;  %v3483_v42 = vmul.f32 0.03125, %v3479_v41  ;;  %v3476_v43 = vpop.xlane.xlu1 %3475 }
0x187b   : > { %4559 = vrsqrt.f32 %v3484_v22  ;;  %v3482_v30 = vmul.f32 0.03125, %v3476_v43 }
0x187c   : > { %v3487_v44 = vadd.f32 1e-05, %v3483_v42 }
0x187d   : > { %v3486_v29 = vadd.f32 1e-05, %v3482_v30 }
0x187e   : > { %4561 = vrsqrt.f32 %v3487_v44 }
0x187f   : > { %4563 = vrsqrt.f32 %v3486_v29 }
0x1884   : > { %v4558_v32 = vpop.eup %4557 }
0x1885   : > { %v4560_v6 = vpop.eup %4559  ;;  %v3493_v51 = vmul.f32 %v4558_v32, %v3461_v19  ;;  %v3548_v19 = vsub.s32 %v4723_v45, %v4719_v34 }
0x1886   : > { %v3492_v54 = vmul.f32 %v4560_v6, %v3460_v27 }
0x1887   : > { %v3501_v55 = vmul.f32 %v3777_v31, %v3493_v51 }
0x1888   : > { %v4562_v57 = vpop.eup %4561  ;;  %v3500_v58 = vmul.f32 %v3777_v31, %v3492_v54 }
0x1889   : > { %v4564_v62 = vpop.eup %4563  ;;  %v3509_v63 = vadd.f32 %v3778_v52, %v3501_v55  ;;  %v3495_v9 = vmul.f32 %v4562_v57, %v3463_v33 }
0x188a   : > { %v3508_v8 = vadd.f32 %v3778_v52, %v3500_v58  ;;  %v3494_v17 = vmul.f32 %v4564_v62, %v3462_v35 }
0x188b   : > { %v3518_v56 = vmul.f32 %v3779_v24, %v3509_v63  ;;  %v3503_v53 = vmul.f32 %v3777_v31, %v3495_v9 }
0x188c   : > { %v3517_v3 = vmul.f32 %v3779_v24, %v3508_v8  ;;  %v3502_v46 = vmul.f32 %v3777_v31, %v3494_v17 }
0x188d   : > { %v3524_v11 = vsel %vm392_vm0, %v3518_v56, 0.0  ;;  %v3511_v48 = vadd.f32 %v3778_v52, %v3503_v53 }
0x188e   : > { %3525 = vadd.xlane.f32.xlu0 %v3524_v11  ;;  %v3521_v18 = vsel %vm392_vm0, %v3517_v3, 0.0  ;;  %v3510_v59 = vadd.f32 %v3778_v52, %v3502_v46 }
0x188f   : > { %3522 = vadd.xlane.f32.xlu1 %v3521_v18  ;;  %v3520_v23 = vmul.f32 %v3779_v24, %v3511_v48 }
0x1890   : > { %v3519_v10 = vmul.f32 %v3779_v24, %v3510_v59 }
0x1891   : > { %v3530_v50 = vsel %vm392_vm0, %v3520_v23, 0.0 }
0x1892   : > { %3531 = vadd.xlane.f32.xlu0 %v3530_v50  ;;  %v3527_v2 = vsel %vm392_vm0, %v3519_v10, 0.0  ;;  %vm3566_vm0 = vcmask 1041409  }
0x1893   : > { %3528 = vadd.xlane.f32.xlu1 %v3527_v2 }
0x191b   : > { %v3526_v25 = vpop.xlane.xlu0 %3525 }
0x191c   : > { %v3523_v1 = vpop.xlane.xlu1 %3522  ;;  %v3539_v26 = vadd.f32 %v3536_v60, %v3526_v25 }
0x191d   : > { %v3538_v27 = vadd.f32 %v3536_v60, %v3523_v1 }
0x191e   : > { %v3554_v14 = vrot.slane %v3539_v26, %v3553_v49 }
0x191f   : > { %v3532_v28 = vpop.xlane.xlu0 %3531  ;;  %v3549_v12 = vrot.slane %v3538_v27, %v3548_v19 }
0x1920   : > { %v3541_v7 = vadd.f32 %v3536_v60, %v3532_v28  ;;  %v3529_v47 = vpop.xlane.xlu1 %3528 }
0x1921   : > { %v3540_v5 = vadd.f32 %v3536_v60, %v3529_v47  ;;  %v3556_v35 = vsel %vm3555_vm15, %v3554_v14, %v3549_v12 }
0x1922   : > { %v3564_v33 = vrot.slane %v3541_v7, %v3553_v49 }
0x1923   : > { %v3560_v4 = vrot.slane %v3540_v5, %v3548_v19 }
0x1925   : > { %v3565_v36 = vsel %vm3555_vm15, %v3564_v33, %v3560_v4 }
0x1926   : > { %v3567_v34 = vsel %vm3566_vm0, %v3565_v36, %v3556_v35 }
0x1927   : > { %3570 = vst.msk [vmem:[%s320_s21] sm:$0x3] %vm3569_vm1, %v3567_v34 }
0x1928 PF: > { %s18_s27 = sadd.s32 1, %s4571_s27  }
0x1929   : > { %p15_p4 = scmp.ge.s32.totalorder %s18_s27, 4  }
0x192b   :  { %17 = sbr.rel (!%p15_p4) target bundleno = 1 (0x1), region = 90 }

</bundles_post_ra>
